<compile_context>
chip_gen: v5e
topology: v5e:2x2
jax: 0.10.0
libtpu: 0.0.40
codegen_flags: <defaults>
</compile_context>

<pallas_src>
import numpy as np
import jax
import jax.numpy as jnp
from jax.experimental import pallas as pl
from jax.experimental.pallas import tpu as pltpu


def _round_up(x, m):
    return ((x + m - 1) // m) * m


# ----------------------------------------------------------------------------
# Pallas kernel: pointwise (1x1x1) conv == channel matmul + bias per spatial tile
# ----------------------------------------------------------------------------
def _conv1x1_kernel(x_ref, w_ref, b_ref, o_ref):
    # x_ref: (Cin, tn) native dtype   w_ref: (Cout_pad, Cin) bf16
    # b_ref: (Cout_pad, 1) f32        o_ref: (Cout_pad, tn) bf16
    x = x_ref[...].astype(jnp.bfloat16)          # in-kernel cast; no extra HBM pass
    acc = jnp.dot(w_ref[...], x, preferred_element_type=jnp.float32)
    o_ref[...] = (acc + b_ref[...]).astype(o_ref.dtype)


def conv1x1x1_pallas(x_ncdhw, w_bf16, bias_f32, *, tn=8192,
                     pallas_min_bytes=1 << 20):
    """1x1x1 Conv3d with PyTorch NCDHW input semantics.

    x_ncdhw: (B, Cin, D, H, W)      (native dtype, typically f32)
    w_bf16:  (Cout_pad, Cin) bf16   (torch weight (Cout,Cin,1,1,1) squeezed + row-padded)
    bias_f32:(Cout_pad,) f32
    returns: (B, Cout_pad, D*H*W) bfloat16 (native conv orientation, channels first)
    """
    B, C, D, H, W = x_ncdhw.shape
    Cout = w_bf16.shape[0]
    S = D * H * W
    x3 = x_ncdhw.reshape(B, C, S)        # contiguous view — no NCDHW->NDHWC transpose

    # Tiny levels: pallas dispatch / pipeline warm-up dominates -> fused XLA path.
    if x3.size * x3.dtype.itemsize < pallas_min_bytes:
        acc = jnp.einsum("oc,bcs->bos", w_bf16, x3.astype(jnp.bfloat16),
                         preferred_element_type=jnp.float32)
        return (acc + bias_f32.astype(jnp.float32)[None, :, None]).astype(jnp.bfloat16)

    # Spatial tile: big (amortize per-step overhead), lane dim always a multiple
    # of 128 (or the full extent).  No padding pass; cdiv grid + partial tail block.
    tn_eff = min(tn, S)
    if B == 1 and S > 2 * 128:
        # Keep >= 2 parallel grid steps so both v7x TensorCores get work.
        tn_eff = min(tn_eff, _round_up(pl.cdiv(S, 2), 128))
    grid = (B, pl.cdiv(S, tn_eff))

    out = pl.pallas_call(
        _conv1x1_kernel,
        out_shape=jax.ShapeDtypeStruct((B, Cout, S), jnp.bfloat16),
        grid_spec=pltpu.PrefetchScalarGridSpec(
            num_scalar_prefetch=0,
            grid=grid,
            in_specs=[
                # activations: native-dtype spatial tiles, lane dim = spatial
                pl.BlockSpec((None, C, tn_eff), lambda b, j: (b, 0, j)),
                # weight / bias: single resident block (constant index_map)
                pl.BlockSpec((Cout, C), lambda b, j: (0, 0)),
                pl.BlockSpec((Cout, 1), lambda b, j: (0, 0)),
            ],
            out_specs=pl.BlockSpec((None, Cout, tn_eff), lambda b, j: (b, 0, j)),
        ),
        compiler_params=pltpu.CompilerParams(
            dimension_semantics=("parallel", "parallel"),
            vmem_limit_bytes=32 * 1024 * 1024,
        ),
    )(x3, w_bf16, bias_f32.astype(jnp.float32).reshape(Cout, 1))
    return out


# ----------------------------------------------------------------------------
# AnchorNetworkConv forward (JAX glue around the Pallas conv kernel)
# ----------------------------------------------------------------------------
class AnchorNetworkConvPallas:
    def __init__(self, raw_anchor_levels, conv_stride_levels, channels_levels,
                 allowed_border=0, key=None):
        assert len(raw_anchor_levels) == len(conv_stride_levels) == len(channels_levels)
        self.raw_anchor_levels = [jnp.asarray(a, jnp.float32) for a in raw_anchor_levels]
        self.conv_stride_levels = list(conv_stride_levels)
        self.allowed_border = allowed_border
        self.num_dims = int(np.asarray(raw_anchor_levels[0]).shape[1])
        self.num_anchor_levels = [int(np.asarray(a).shape[0]) for a in raw_anchor_levels]
        self.fields_per_anchor = 2 * self.num_dims + 1  # bbox deltas + score

        # Deterministic parameter init matching nn.Conv3d default
        # (uniform(-1/sqrt(fan_in), 1/sqrt(fan_in))), weight stored as (Cout, Cin).
        # Cout is padded up to a multiple of 8 (sublane-aligned output stores);
        # the padding rows are zero and are sliced off in forward().
        if key is None:
            key = jax.random.PRNGKey(42)
        self.weights_bf16 = []
        self.biases = []
        self.cout_levels = []
        for cin, num_anchors in zip(channels_levels, self.num_anchor_levels):
            cout = num_anchors * self.fields_per_anchor
            cout_pad = _round_up(cout, 8)
            key, kw, kb = jax.random.split(key, 3)
            bound = 1.0 / np.sqrt(cin)  # fan_in = cin * 1 * 1 * 1
            w = jax.random.uniform(kw, (cout, cin), jnp.float32, -bound, bound)
            b = jax.random.uniform(kb, (cout,), jnp.float32, -bound, bound)
            w_pad = jnp.zeros((cout_pad, cin), jnp.float32).at[:cout].set(w)
            b_pad = jnp.zeros((cout_pad,), jnp.float32).at[:cout].set(b)
            self.weights_bf16.append(w_pad.astype(jnp.bfloat16))
            self.biases.append(b_pad)
            self.cout_levels.append(cout)

    def _anchor_description(self, scene_shape, feat_shapes):
        # TODO(synk): the original AnchorStorage (anchor grid generation, border
        # filtering, device caching) is not provided; return a lightweight
        # description with a simple anchor grid per level.
        anchors_levels = []
        for raw, stride, fshape in zip(self.raw_anchor_levels,
                                       self.conv_stride_levels, feat_shapes):
            grids = jnp.meshgrid(*[jnp.arange(s, dtype=jnp.float32) for s in fshape],
                                 indexing="ij")
            centers = jnp.stack(grids, axis=-1).reshape(-1, self.num_dims) * stride
            anc = centers[:, None, :].repeat(raw.shape[0], axis=1)
            anc = jnp.concatenate([anc, anc + raw[None, :, :]], axis=-1)
            anchors_levels.append(anc.reshape(-1, 2 * self.num_dims))
        return {
            "scene_shape": tuple(scene_shape),
            "feat_shapes": [tuple(s) for s in feat_shapes],
            "conv_strides": self.conv_stride_levels,
            "num_anchors_per_level": self.num_anchor_levels,
            "anchors_levels": anchors_levels,
            "allowed_border": self.allowed_border,
        }

    def forward(self, rpn_feat_levels, scene_shape):
        feat_shapes = [tuple(f.shape[2:]) for f in rpn_feat_levels]
        anchor_description = self._anchor_description(scene_shape, feat_shapes)

        nd = self.num_dims
        fields = self.fields_per_anchor
        rpn_bbox_levels, rpn_score_levels = [], []
        for feat, w_bf16, b, A, cout in zip(rpn_feat_levels, self.weights_bf16,
                                            self.biases, self.num_anchor_levels,
                                            self.cout_levels):
            B = feat.shape[0]
            S = int(np.prod(feat.shape[2:]))
            out = conv1x1x1_pallas(feat, w_bf16, b)          # (B, Cout_pad, S) bf16
            # rpn_permuter (restructured): drop Cout padding, split bbox/score
            # BEFORE the transpose, and transpose in bf16.
            out = out[:, :cout, :].reshape(B, A, fields, S)
            bbox = out[:, :, : 2 * nd, :]                    # (B, A, 2*nd, S)
            score = out[:, :, 2 * nd, :]                     # (B, A, S)
            bbox = jnp.transpose(bbox, (0, 3, 1, 2)).reshape(B, S * A, 2 * nd)
            score = jnp.transpose(score, (0, 2, 1)).reshape(B, S * A)
            rpn_bbox_levels.append(bbox)
            rpn_score_levels.append(score)

        # Final outputs in f32 to match the original torch module's dtype.
        rpn_bbox = jnp.concatenate(rpn_bbox_levels, axis=1).astype(jnp.float32)
        rpn_score = jnp.concatenate(rpn_score_levels, axis=1).astype(jnp.float32)
        return rpn_bbox, rpn_score, anchor_description

    __call__ = forward


# ----------------------------------------------------------------------------
# Demo / self-check
# ----------------------------------------------------------------------------
if __name__ == "__main__":
    key = jax.random.PRNGKey(0)

    # Synthetic config: 3 feature pyramid levels, 3D anchors (num_dims = 3).
    raw_anchor_levels = [
        np.array([[4.0, 4.0, 4.0],
                  [8.0, 4.0, 4.0],
                  [4.0, 8.0, 4.0]], dtype=np.float32),    # 3 anchors -> Cout 21 (pad 24)
        np.array([[8.0, 8.0, 8.0],
                  [16.0, 8.0, 8.0]], dtype=np.float32),   # 2 anchors -> Cout 14 (pad 16)
        np.array([[32.0, 32.0, 32.0],
                  [64.0, 32.0, 32.0]], dtype=np.float32), # 2 anchors -> Cout 14 (pad 16)
    ]
    conv_stride_levels = [4, 8, 32]
    channels_levels = [32, 64, 16]
    scene_shape = (96, 96, 96)

    model = AnchorNetworkConvPallas(raw_anchor_levels, conv_stride_levels,
                                    channels_levels, allowed_border=0,
                                    key=jax.random.PRNGKey(1))

    # Feature maps: NCDHW, consistent with scene_shape / strides.
    # Level 0 (S=13824, 3.4 MiB) exercises the Pallas path incl. a partial tail
    # tile (13824 % 8192 != 0); levels 1/2 take the small-level einsum fallback.
    k0, k1, k2 = jax.random.split(key, 3)
    rpn_feat_levels = [
        jax.random.normal(k0, (2, 32, 24, 24, 24), jnp.float32),  # S=13824 -> Pallas
        jax.random.normal(k1, (2, 64, 12, 12, 12), jnp.float32),  # S=1728  -> XLA fallback
        jax.random.normal(k2, (2, 16, 3, 3, 3), jnp.float32),     # S=27    -> XLA fallback
    ]

    rpn_bbox, rpn_score, anchor_description = model(rpn_feat_levels, scene_shape)
    jax.block_until_ready((rpn_bbox, rpn_score))

    # Reference: plain-JAX pointwise conv with the same numerics
    # (bf16 operands, f32 accumulate + bias, bf16 output, identical permuter).
    nd = model.num_dims
    fields = model.fields_per_anchor
    ref_bbox, ref_score = [], []
    for feat, w_bf16, b_pad, A, cout in zip(rpn_feat_levels, model.weights_bf16,
                                            model.biases, model.num_anchor_levels,
                                            model.cout_levels):
        B, C = feat.shape[:2]
        S = int(np.prod(feat.shape[2:]))
        x3 = feat.reshape(B, C, S).astype(jnp.bfloat16)
        acc = jnp.einsum("oc,bcs->bos", w_bf16, x3,
                         preferred_element_type=jnp.float32)
        out = (acc + b_pad[None, :, None]).astype(jnp.bfloat16)
        out = out[:, :cout, :].reshape(B, A, fields, S)
        bbox = jnp.transpose(out[:, :, : 2 * nd, :], (0, 3, 1, 2)).reshape(B, S * A, 2 * nd)
        score = jnp.transpose(out[:, :, 2 * nd, :], (0, 2, 1)).reshape(B, S * A)
        ref_bbox.append(bbox)
        ref_score.append(score)
    ref_bbox = jnp.concatenate(ref_bbox, axis=1).astype(jnp.float32)
    ref_score = jnp.concatenate(ref_score, axis=1).astype(jnp.float32)

    assert rpn_bbox.shape == ref_bbox.shape and rpn_score.shape == ref_score.shape
    np.testing.assert_allclose(np.asarray(rpn_bbox), np.asarray(ref_bbox),
                               rtol=2e-2, atol=2e-2)
    np.testing.assert_allclose(np.asarray(rpn_score), np.asarray(ref_score),
                               rtol=2e-2, atol=2e-2)
    print("KERNEL_OK")
</pallas_src>

<mosaic_0001>
module attributes {stable_mosaic.version = 11 : i64} {
  func.func @_conv1x1_kernel(%arg0: i32, %arg1: i32, %arg2: memref<1x32x8192xf32, #tpu.memory_space<vmem>>, %arg3: memref<24x32xbf16, #tpu.memory_space<vmem>>, %arg4: memref<24x1xf32, #tpu.memory_space<vmem>>, %arg5: memref<1x24x8192xbf16, #tpu.memory_space<vmem>>) attributes {dimension_semantics = [#tpu.dimension_semantics<parallel>, #tpu.dimension_semantics<parallel>], iteration_bounds = array<i64: 2, 2>, scalar_prefetch = 0 : i64, scratch_operands = 0 : i64, tpu.core_type = #tpu.core_type<tc>, window_params = [{transform_indices = @transform_0, window_bounds = array<i64: 1, 32, 8192>}, {pipeline_mode = #tpu.pipeline_mode<synchronous>, transform_indices = @transform_1, window_bounds = array<i64: 24, 32>}, {pipeline_mode = #tpu.pipeline_mode<synchronous>, transform_indices = @transform_2, window_bounds = array<i64: 24, 1>}, {transform_indices = @transform_3, window_bounds = array<i64: 1, 24, 8192>}]} {
    %c0 = arith.constant 0 : index
    %c0_0 = arith.constant 0 : index
    %c0_1 = arith.constant 0 : index
    %0 = vector.load %arg2[%c0, %c0_0, %c0_1] : memref<1x32x8192xf32, #tpu.memory_space<vmem>>, vector<1x32x8192xf32>
    %1 = vector.shape_cast %0 : vector<1x32x8192xf32> to vector<32x8192xf32>
    %2 = arith.truncf %1 : vector<32x8192xf32> to vector<32x8192xbf16>
    %c0_2 = arith.constant 0 : index
    %c0_3 = arith.constant 0 : index
    %3 = vector.load %arg3[%c0_2, %c0_3] : memref<24x32xbf16, #tpu.memory_space<vmem>>, vector<24x32xbf16>
    %cst = arith.constant dense<0.000000e+00> : vector<24x8192xf32>
    %4 = tpu.matmul %3, %2, %cst {dimension_numbers = #tpu.dot_dimension_numbers<[1], [0], [0], [1], [0, 0, 1, 1], [], []>} : vector<24x32xbf16>, vector<32x8192xbf16>, vector<24x8192xf32> -> vector<24x8192xf32>
    %c0_4 = arith.constant 0 : index
    %c0_5 = arith.constant 0 : index
    %5 = vector.load %arg4[%c0_4, %c0_5] : memref<24x1xf32, #tpu.memory_space<vmem>>, vector<24x1xf32>
    %6 = vector.broadcast %5 : vector<24x1xf32> to vector<24x8192xf32>
    %7 = arith.addf %4, %6 : vector<24x8192xf32>
    %8 = arith.truncf %7 : vector<24x8192xf32> to vector<24x8192xbf16>
    %c0_6 = arith.constant 0 : index
    %c0_7 = arith.constant 0 : index
    %c0_8 = arith.constant 0 : index
    %9 = vector.load %arg5[%c0_6, %c0_7, %c0_8] : memref<1x24x8192xbf16, #tpu.memory_space<vmem>>, vector<1x24x8192xbf16>
    %10 = vector.shape_cast %9 : vector<1x24x8192xbf16> to vector<24x8192xbf16>
    %11 = vector.shape_cast %8 : vector<24x8192xbf16> to vector<1x24x8192xbf16>
    tpu.vector_store %arg5[%c0_6, %c0_7, %c0_8], %11 {strides = array<i32>} : memref<1x24x8192xbf16, #tpu.memory_space<vmem>>, vector<1x24x8192xbf16>,
    return
  }
  func.func @transform_0(%arg0: i32, %arg1: i32) -> (i32, i32, i32) {
    %c0_i32 = arith.constant 0 : i32
    %c0_i32_0 = arith.constant 0 : i32
    return %arg0, %c0_i32, %arg1 : i32, i32, i32
  }
  func.func @transform_1(%arg0: i32, %arg1: i32) -> (i32, i32) {
    %c0_i32 = arith.constant 0 : i32
    %c0_i32_0 = arith.constant 0 : i32
    %c0_i32_1 = arith.constant 0 : i32
    return %c0_i32, %c0_i32_0 : i32, i32
  }
  func.func @transform_2(%arg0: i32, %arg1: i32) -> (i32, i32) {
    %c0_i32 = arith.constant 0 : i32
    %c0_i32_0 = arith.constant 0 : i32
    %c0_i32_1 = arith.constant 0 : i32
    return %c0_i32, %c0_i32_0 : i32, i32
  }
  func.func @transform_3(%arg0: i32, %arg1: i32) -> (i32, i32, i32) {
    %c0_i32 = arith.constant 0 : i32
    %c0_i32_0 = arith.constant 0 : i32
    return %arg0, %c0_i32, %arg1 : i32, i32, i32
  }
}

</mosaic_0001>

<bundles_post_ra>
// kernel: tpu_custom_call.1
= control target key start
LH: loop header
LB: loop body
LE: loop exit
PB: predicated region body
PF: predicated region fallthrough
CT: control target
= control target key end

     0   :  { %s3641_s0 = inlined_call_operand.hbm [shape: f32[2,32,13824], index: 0, kind: input, shape index: {}]   ;;  %s3642_s1 = inlined_call_operand.hbm [shape: bf16[24,32], index: 1, kind: input, shape index: {}]   ;;  %s3643_s2 = inlined_call_operand.vmem [shape: f32[24,1], index: 2, kind: input, shape index: {}]   ;;  %s3644_s3 = inlined_call_operand.hbm [shape: bf16[2,24,13824], index: 3, kind: output, shape index: {}]  }
   0x1   :  { %3651 = sst [smem:[#allocation18_spill]] %s3642_s1 }
   0x2   :  { %8 = vsyncpa [#allocation3], 0 }
   0x3   :  { %10 = vsyncpa [#allocation3 + $0x1], 0 }
   0x4   :  { %11 = vsyncpa [#allocation6], 0 }
   0x5   :  { %12 = vsyncpa [#allocation4], 0 }
   0x6   :  { %14 = vsyncpa [#allocation4 + $0x1], 0  ;;  %s2604_s12 = smov 0   ;;  %s2606_s13 = smov 0  }
   0x7   :  { %s2608_s14 = smov 0   ;;  %s2610_s15 = smov 0  }
   0x8   :  { %s2612_s16 = smov 0   ;;  %s2614_s17 = smov 0  }
   0x9   :  { %s2616_s18 = smov 0   ;;  %s2618_s19 = smov 0  }
   0xa LB: > { %3652 = sst [smem:[#allocation11_spill]] %s2552_s14  ;;  %s2135_s20 = sadd.s32 4294967295, %s2572_s19   ;;  %s2572_s19 = sphi %s2618_s19, %s20_s19   ;;  %s2568_s18 = sphi %s2616_s18, %s3674_s18   ;;  %s2564_s17 = sphi %s2614_s17, %s3673_s17   ;;  %s2560_s16 = sphi %s2612_s16, %s3672_s16   ;;  %s2556_s15 = sphi %s2610_s15, %s3671_s15   ;;  %s2552_s14 = sphi %s2608_s14, %s3670_s14   ;;  %s2548_s13 = sphi %s2606_s13, %s3676_s13   ;;  %s2544_s12 = sphi %s2604_s12, %s3675_s12  }
   0xb   : > { %3653 = sst [smem:[#allocation12_spill]] %s2564_s17  ;;  %s2136_s21 = sadd.s32 4294967294, %s2572_s19  }
   0xc   : > { %3654 = sst [smem:[#allocation13_spill]] %s2568_s18  ;;  %s29_s22 = sadd.s32 1, %s2564_s17 }
   0xd   : > { %s32_s23 = sadd.s32 1, %s2568_s18  ;;  %p30_p0 = scmp.ge.s32.totalorder %s29_s22, 2 }
   0xe   : > { %s41_s24 = sadd.s32 1, %s2552_s14  ;;  %p48_p1 = scmp.ne.s32.totalorder %s2552_s14, %s2548_s13 }
   0xf   : > { %p49_p2 = scmp.eq.s32.totalorder %s2572_s19, 0  ;;  %s3678_s22 = smov (%p30_p0, %s29_s22), 0 }
  0x10   : > { %3655 = sst [smem:[#allocation14_spill]] %s3678_s22  ;;  %s3680_s23 = smov (!%p30_p0, %s32_s23), %s2568_s18 }
  0x11   : > { %s37_s25 = ssub.s32 %s2564_s17, %s3678_s22  ;;  %p2657_p3 = por %p49_p2, %p48_p1 }
  0x12   : > { %p34_p4 = scmp.ge.s32.totalorder %s3680_s23, 2  ;;  %p54_p5 = scmp.ne.s32.totalorder %s2548_s13, %s2544_s12 }
  0x13   : > { %p2663_p6 = scmp.eq.s32.totalorder %s2135_s20, 0  ;;  %p122_p7 = scmp.eq.s32.totalorder %s2135_s20, 3 }
  0x14   : > { %s3682_s23 = smov (%p34_p4, %s3680_s23), 0  ;;  %p128_p10 = scmp.eq.s32.totalorder %s2136_s21, 3 }
  0x15   : > { %3658 = sst [smem:[#allocation15_spill]] %s3682_s23  ;;  %p2671_p8 = por %p2663_p6, %p54_p5 }
  0x16   : > { %p2675_p9 = por %p122_p7, %p48_p1  ;;  %s36_s30 = ssub.s32 %s2568_s18, %s3682_s23 }
  0x17   : > { %s38_s4 = sor.u32 %s37_s25, %s36_s30  ;;  %p2137_p11 = scmp.ge.s32.totalorder %s2572_s19, 1 }
  0x18   : > { %p39_p12 = scmp.eq.s32.totalorder %s38_s4, 0  ;;  %p2682_p13 = por %p128_p10, %p54_p5 }
  0x19   : > { %p135_p0 = scmp.lt.s32.totalorder %s2572_s19, 5  ;;  %s3665_s1 = sld [smem:[#allocation18_spill]] }
  0x1a   : > { %s3661_s5 = scalar_select %p2682_p13, 1, 0 }
  0x1b   : > { %s2688_s6 = scalar_select %p39_p12, %s2552_s14, %s41_s24  }
  0x1c   : > { %3662 = sst [smem:[#allocation16_spill]] %s3661_s5  ;;  %p2690_p2 = pnand %p2137_p11, %p135_p0 }
  0x1d   : > { %3663 = sst [smem:[#allocation17_spill]] %s2688_s6  ;;  %s2574_s11 = smov [#allocation5]  }
  0x1e   : > { %p2303_p1 = pneg %p2690_p2  ;;  %s148_s20 = sshll.u32 %s2574_s11, 4  ;;  %s149_s20 = int_to_ptr.vmem [resolvable:$true] %s148_s20 }
  0x1f   : > { %s146_s10 = sshll.u32 %s3665_s1, 4  ;;  %s2575_s21 = smov 64   ;;  %s147_s10 = int_to_ptr.hbm [resolvable:$true] %s146_s10 }
  0x20   : > { %p2304_p4 = pnand %p2303_p1, %p2663_p6  ;;  %s2576_s24 = smov 4  }
  0x21   : > { %p2139_p5 = scmp.ge.s32.totalorder %s2572_s19, 4 }
  0x22   : > { %2306 = dma.hbm_to_vmem [thread:$0]  (!%p2304_p4), %s147_s10, 192, %s149_s20, [#allocation6], %s2575_s21, %s2575_s21, %s2576_s24  }
  0x23   : > { %161 = sbr.rel (%p2139_p5) target bundleno = 66 (0x42), region = 24 }
  0x28   : > { %164 = sbr.rel (!%p2657_p3) target bundleno = 66 (0x42), region = 28  ;;  %s165_s25 = sand.u32 (%p2657_p3), 1, %s2552_s14  }
  0x29   : > { %s2141_s30 = sshll.u32 (%p2657_p3), %s2564_s17, 6  ;;  %s2140_s4 = sshll.u32 (%p2657_p3), %s165_s25, 11 }
  0x2a   : > { %s171_s8 = ssub.s32 (%p2657_p3), 108, %s2141_s30  ;;  %s2709_s10 = scalar_lea.sflag (%p2657_p3), [#allocation3], %s165_s25 }
  0x2b   : > { %p172_p7 = scmp.lt.s32.totalorder (%p2657_p3), %s171_s8, 64  ;;  %s169_s20 = scalar_lea.vmem (%p2657_p3), [#allocation2], %s2140_s4 }
  0x2d   : > { %s3684_s8 = smov (!%p172_p7, %s171_s8), 64 }
  0x2e   : > { %s2142_s9 = sshll.u32 %s3684_s8, 5 }
  0x2f   : > { %s175_s11 = ssub.s32 2048, %s2142_s9 }
  0x30   : > { %s176_s1 = sshll.u32 %s175_s11, 4 }
  0x31   : > { %177 = vsyncadd %s2709_s10, %s176_s1  ;;  %p2712_p3 = scmp.ne.s32.totalorder %s2142_s9, 0  ;;  %s2294_s21 = smul.u32 432, %s2568_s18 }
  0x32   : > { %s2145_s24 = sshll.u32 %s3684_s8, 3  ;;  %s187_s23 = sshll.u32 %s169_s20, 4  ;;  %s188_s23 = int_to_ptr.vmem [resolvable:$true] %s187_s23 }
  0x33   : > { %s180_s22 = sadd.s32 %s2294_s21, %s2141_s30  ;;  %s2292_s11 = sshll.u32 %s3684_s8, 9 }
  0x34   : > { %s2144_s17 = sshll.u32 %s180_s22, 3  ;;  %s2422_s14 = sshrl.u32 %s2292_s11, 4 }
  0x35   : > { %s182_s4 = scalar_lea.hbm %s3641_s0, %s2144_s17  ;;  %s2439_s5 = sshra.s32 %s188_s23, 4  ;;  %s2440_s5 = int_to_ptr.vmem [resolvable:$true] %s2439_s5 }
  0x36   : > { %s185_s1 = sshll.u32 %s182_s4, 4  ;;  %s2446_s9 = scalar_lea.vmem %s2440_s5, %s2422_s14  ;;  %s186_s1 = int_to_ptr.hbm [resolvable:$true] %s185_s1 }
  0x37   : > { %p2447_p10 = scmp.ne.s32.totalorder %s2440_s5, %s2446_s9  ;;  %s2577_s18 = smov [#allocation2]  }
  0x38   : > { %s2450_s20 = scalar_lea.vmem %s2577_s18, 4096 }
  0x39   : > { %p2448_p11 = pnand %p2447_p10, %p2712_p3  ;;  %p2452_p0 = scmp.lt.s32.totalorder %s2450_s20, %s2446_s9 }
  0x3b   : > { %p2449_p12 = pneg %p2448_p11 }
  0x3d   : > { %p2454_p1 = pnand %p2452_p0, %p2449_p12 }
  0x3f   : > { %2457 = shalt.err (!%p2454_p1)
}
  0x40   : > { %s2578_s22 = smov 13824   ;;  %s2579_s6 = smov 8192  }
  0x41   : > { %193 = dma.hbm_to_vmem [thread:$0]  (%p2712_p3), %s186_s1, %s2292_s11, %s188_s23, %s2709_s10, %s2578_s22, %s2579_s6, %s2145_s24  }
  0x42 PF: > { %199 = sbr.rel (%p2690_p2) target bundleno = 760 (0x2f8), region = 32  ;;  %s2730_s14 = sand.u32 (!%p2690_p2), 1, %s2548_s13  }
  0x43   : > { %s2149_s17 = sshll.u32 (!%p2690_p2), %s2730_s14, 11  ;;  %s202_s18 = scalar_lea.sflag (!%p2690_p2), [#allocation3], %s2730_s14 }
  0x44   : > { %s2734_s5 = scalar_lea.vmem (!%p2690_p2), [#allocation2], %s2149_s17 }
  0x47   : > { %2531 = dma.done.wait (%p2671_p8), %s202_s18, 32768  }
  0x48   : > { %2533 = vsyncadd (%p2671_p8), %s202_s18, 4294934528 }
  0x49   : > { %2535 = dma.done.wait (%p2663_p6), [#allocation6], 192  }
  0x4a   : > { %2537 = vsyncadd (%p2663_p6), [#allocation6], 4294967104  ;;  %v2580_v0 = vmov 0   ;;  %v373_v1 = vld [vmem:[%s2734_s5 + $0x400] sm:$0xff]  ;;  %v374_v3 = vld [vmem:[%s2734_s5 + $0x408] sm:$0xff]  ;;  %vm658_vm0 = vcmask 261120  }
  0x4b   : > { %2386 = vset.pattern.permute.xlu0 %v2580_v0  ;;  %2387 = vset.pattern.permute.xlu1 %v2580_v0  ;;  %v437_v2 = vld [vmem:[%s2734_s5 + $0x600] sm:$0xff]  ;;  %v438_v5 = vld [vmem:[%s2734_s5 + $0x608] sm:$0xff]  ;;  %v375_v6 = vld [vmem:[%s2734_s5 + $0x410] sm:$0xff]  ;;  %s2295_s10 = smul.u32 768, %s2730_s14  ;;  %s2010_s21 = scalar_lea.sflag [#allocation4], %s2730_s14 }
  0x4c   : > { %v565_v4 = vpack.c.bf16 %v437_v2, %v373_v1  ;;  %v439_v7 = vld [vmem:[%s2734_s5 + $0x610] sm:$0xff]  ;;  %v566_v8 = vpack.c.bf16 %v438_v5, %v374_v3  ;;  %v376_v10 = vld [vmem:[%s2734_s5 + $0x418] sm:$0xff]  ;;  %v245_v12 = vld [vmem:[%s2734_s5] sm:$0xff]  ;;  %s2283_s24 = sshll.u32 (%p2675_p9), %s2556_s15, 6 }
  0x4d   : > { %v567_v9 = vpack.c.bf16 %v439_v7, %v375_v6  ;;  %v440_v11 = vld [vmem:[%s2734_s5 + $0x618] sm:$0xff]  ;;  %v309_v14 = vld [vmem:[%s2734_s5 + $0x200] sm:$0xff]  ;;  %v246_v15 = vld [vmem:[%s2734_s5 + $0x8] sm:$0xff]  ;;  %s2930_s26 = scalar_lea.vmem [#allocation7], %s2295_s10  ;;  %s2018_s11 = ssub.s32 (%p2675_p9), 108, %s2283_s24 }
  0x4e   : > { %671 = vmatpush.bf16.msra.mxu0 %v565_v4  ;;  %v568_v13 = vpack.c.bf16 %v440_v11, %v376_v10  ;;  %v310_v16 = vld [vmem:[%s2734_s5 + $0x208] sm:$0xff]  ;;  %689 = vmatpush.bf16.msra.mxu1 %v566_v8  ;;  %v501_v17 = vpack.c.bf16 %v309_v14, %v245_v12  ;;  %v247_v19 = vld [vmem:[%s2734_s5 + $0x10] sm:$0xff]  ;;  %v248_v21 = vld [vmem:[%s2734_s5 + $0x18] sm:$0xff]  ;;  %p2019_p6 = scmp.lt.s32.totalorder (%p2675_p9), %s2018_s11, 64 }
  0x4f   : > { %707 = vmatpush.bf16.msra.mxu2 %v567_v9  ;;  %v502_v18 = vpack.c.bf16 %v310_v16, %v246_v15  ;;  %v311_v20 = vld [vmem:[%s2734_s5 + $0x210] sm:$0xff]  ;;  %v312_v23 = vld [vmem:[%s2734_s5 + $0x218] sm:$0xff]  ;;  %v2760_v24 = vld [vmem:[#allocation5] sm:$0xff] }
  0x50   : > { %725 = vmatpush.bf16.msra.mxu3 %v568_v13  ;;  %v503_v22 = vpack.c.bf16 %v311_v20, %v247_v19  ;;  %v379_v25 = vld [vmem:[%s2734_s5 + $0x430] sm:$0xff]  ;;  %v504_v26 = vpack.c.bf16 %v312_v23, %v248_v21  ;;  %v380_v28 = vld [vmem:[%s2734_s5 + $0x438] sm:$0xff]  ;;  %v377_v32 = vld [vmem:[%s2734_s5 + $0x420] sm:$0xff] }
  0x51   : > { %v443_v27 = vld [vmem:[%s2734_s5 + $0x630] sm:$0xff]  ;;  %v444_v29 = vld [vmem:[%s2734_s5 + $0x638] sm:$0xff]  ;;  %v441_v33 = vld [vmem:[%s2734_s5 + $0x620] sm:$0xff] }
  0x52   : > { %672 = vmatpush.bf16.msra.mxu0 %v501_v17  ;;  %v571_v30 = vpack.c.bf16 %v443_v27, %v379_v25  ;;  %v572_v31 = vpack.c.bf16 %v444_v29, %v380_v28  ;;  %v378_v34 = vld [vmem:[%s2734_s5 + $0x428] sm:$0xff]  ;;  %690 = vmatpush.bf16.msra.mxu1 %v502_v18  ;;  %v569_v35 = vpack.c.bf16 %v441_v33, %v377_v32  ;;  %v251_v38 = vld [vmem:[%s2734_s5 + $0x30] sm:$0xff]  ;;  %v252_v40 = vld [vmem:[%s2734_s5 + $0x38] sm:$0xff] }
  0x53   : > { %708 = vmatpush.bf16.msra.mxu2 %v503_v22  ;;  %v442_v36 = vld [vmem:[%s2734_s5 + $0x628] sm:$0xff]  ;;  %v315_v39 = vld [vmem:[%s2734_s5 + $0x230] sm:$0xff]  ;;  %v632_v41 = vld [vmem:[%s3643_s2] sm:$0xff] }
  0x54   : > { %726 = vmatpush.bf16.msra.mxu3 %v504_v26  ;;  %v570_v37 = vpack.c.bf16 %v442_v36, %v378_v34  ;;  %v507_v42 = vpack.c.bf16 %v315_v39, %v251_v38  ;;  %v316_v43 = vld [vmem:[%s2734_s5 + $0x238] sm:$0xff]  ;;  %v249_v44 = vld [vmem:[%s2734_s5 + $0x20] sm:$0xff]  ;;  %v250_v47 = vld [vmem:[%s2734_s5 + $0x28] sm:$0xff]  ;;  %637 = vperm.xlu0 %2386, %v632_v41  }
  0x55   : > { %2155 = vmatmul.msk.bf16.vlgmr.msra.gmra.mxu0 %vm658_vm0, %v2760_v24  ;;  %2157 = vmatmul.msk.bf16.vlgmr.msra.gmra.mxu1 %vm658_vm0, %v2760_v24  ;;  %v508_v45 = vpack.c.bf16 %v316_v43, %v252_v40  ;;  %v313_v46 = vld [vmem:[%s2734_s5 + $0x220] sm:$0xff]  ;;  %v314_v48 = vld [vmem:[%s2734_s5 + $0x228] sm:$0xff]  ;;  %v383_v50 = vld [vmem:[%s2734_s5 + $0x450] sm:$0xff] }
  0x56   : > { %2159 = vmatmul.msk.bf16.vlgmr.msra.gmra.mxu2 %vm658_vm0, %v2760_v24  ;;  %743 = vmatpush.bf16.msrb.mxu0 %v569_v35  ;;  %v505_v49 = vpack.c.bf16 %v313_v46, %v249_v44  ;;  %v447_v51 = vld [vmem:[%s2734_s5 + $0x650] sm:$0xff]  ;;  %v384_v52 = vld [vmem:[%s2734_s5 + $0x458] sm:$0xff]  ;;  %v506_v53 = vpack.c.bf16 %v314_v48, %v250_v47  ;;  %v381_v57 = vld [vmem:[%s2734_s5 + $0x440] sm:$0xff] }
  0x57   : > { %779 = vmatpush.bf16.msrb.mxu2 %v571_v30  ;;  %2161 = vmatmul.msk.bf16.vlgmr.msra.gmra.mxu3 %vm658_vm0, %v2760_v24  ;;  %v575_v54 = vpack.c.bf16 %v447_v51, %v383_v50  ;;  %v448_v55 = vld [vmem:[%s2734_s5 + $0x658] sm:$0xff]  ;;  %v634_v56 = vld [vmem:[%s3643_s2 + $0x10] sm:$0xff]  ;;  %v445_v59 = vld [vmem:[%s2734_s5 + $0x640] sm:$0xff] }
  0x58   : > { %797 = vmatpush.bf16.msrb.mxu3 %v572_v31  ;;  %761 = vmatpush.bf16.msrb.mxu1 %v570_v37  ;;  %v576_v58 = vpack.c.bf16 %v448_v55, %v384_v52  ;;  %v382_v60 = vld [vmem:[%s2734_s5 + $0x448] sm:$0xff]  ;;  %v573_v63 = vpack.c.bf16 %v445_v59, %v381_v57  ;;  %v255_v4 = vld [vmem:[%s2734_s5 + $0x50] sm:$0xff]  ;;  %v256_v6 = vld [vmem:[%s2734_s5 + $0x58] sm:$0xff] }
  0x59   : > { %v446_v61 = vld [vmem:[%s2734_s5 + $0x648] sm:$0xff]  ;;  %647 = vperm.xlu1 %2387, %v634_v56   ;;  %v319_v5 = vld [vmem:[%s2734_s5 + $0x250] sm:$0xff]  ;;  %v320_v8 = vld [vmem:[%s2734_s5 + $0x258] sm:$0xff] }
  0x5a   : > { %v631_v62 = vld [vmem:[#allocation5 + $0x8] sm:$0xf]  ;;  %v574_v0 = vpack.c.bf16 %v446_v61, %v382_v60  ;;  %744 = vmatpush.bf16.msrb.mxu0 %v505_v49  ;;  %v511_v7 = vpack.c.bf16 %v319_v5, %v255_v4  ;;  %v253_v9 = vld [vmem:[%s2734_s5 + $0x40] sm:$0xff]  ;;  %v512_v11 = vpack.c.bf16 %v320_v8, %v256_v6  ;;  %v387_v16 = vld [vmem:[%s2734_s5 + $0x470] sm:$0xff] }
  0x5b   : > { %780 = vmatpush.bf16.msrb.mxu2 %v507_v42  ;;  %v655_v1 = vunpack.c.l.b16 %v631_v62  ;;  %v633_v2 = vld [vmem:[%s3643_s2 + $0x8] sm:$0xff]  ;;  %v317_v10 = vld [vmem:[%s2734_s5 + $0x240] sm:$0xff]  ;;  %v451_v17 = vld [vmem:[%s2734_s5 + $0x670] sm:$0xff] }
  0x5c   : > { %798 = vmatpush.bf16.msrb.mxu3 %v508_v45  ;;  %762 = vmatpush.bf16.msrb.mxu1 %v506_v53  ;;  %v509_v12 = vpack.c.bf16 %v317_v10, %v253_v9  ;;  %v254_v13 = vld [vmem:[%s2734_s5 + $0x48] sm:$0xff]  ;;  %v388_v18 = vld [vmem:[%s2734_s5 + $0x478] sm:$0xff]  ;;  %v579_v19 = vpack.c.bf16 %v451_v17, %v387_v16  ;;  %v385_v21 = vld [vmem:[%s2734_s5 + $0x460] sm:$0xff] }
  0x5d   : > { %642 = vperm.xlu0 %2386, %v633_v2   ;;  %v2803_v3 = vpack.c.b16 %v655_v1, %v655_v1  ;;  %v318_v14 = vld [vmem:[%s2734_s5 + $0x248] sm:$0xff]  ;;  %v452_v20 = vld [vmem:[%s2734_s5 + $0x678] sm:$0xff]  ;;  %v449_v22 = vld [vmem:[%s2734_s5 + $0x660] sm:$0xff] }
  0x5e   : > { %815 = vmatpush.bf16.msra.mxu0 %v573_v63  ;;  %v510_v15 = vpack.c.bf16 %v318_v14, %v254_v13  ;;  %v580_v23 = vpack.c.bf16 %v452_v20, %v388_v18  ;;  %v577_v25 = vpack.c.bf16 %v449_v22, %v385_v21  ;;  %v386_v26 = vld [vmem:[%s2734_s5 + $0x468] sm:$0xff]  ;;  %v259_v29 = vld [vmem:[%s2734_s5 + $0x70] sm:$0xff]  ;;  %v260_v31 = vld [vmem:[%s2734_s5 + $0x78] sm:$0xff] }
  0x5f   : > { %851 = vmatpush.bf16.msra.mxu2 %v575_v54  ;;  %v450_v27 = vld [vmem:[%s2734_s5 + $0x668] sm:$0xff]  ;;  %v323_v30 = vld [vmem:[%s2734_s5 + $0x270] sm:$0xff]  ;;  %v324_v33 = vld [vmem:[%s2734_s5 + $0x278] sm:$0xff] }
  0x60   : > { %869 = vmatpush.bf16.msra.mxu3 %v576_v58  ;;  %833 = vmatpush.bf16.msra.mxu1 %v574_v0  ;;  %v578_v28 = vpack.c.bf16 %v450_v27, %v386_v26  ;;  %v515_v32 = vpack.c.bf16 %v323_v30, %v259_v29  ;;  %v257_v34 = vld [vmem:[%s2734_s5 + $0x60] sm:$0xff]  ;;  %v516_v36 = vpack.c.bf16 %v324_v33, %v260_v31  ;;  %v258_v38 = vld [vmem:[%s2734_s5 + $0x68] sm:$0xff]  ;;  %v391_v41 = vld [vmem:[%s2734_s5 + $0x490] sm:$0xff] }
  0x61   : > { %v321_v35 = vld [vmem:[%s2734_s5 + $0x260] sm:$0xff]  ;;  %v322_v39 = vld [vmem:[%s2734_s5 + $0x268] sm:$0xff]  ;;  %v455_v42 = vld [vmem:[%s2734_s5 + $0x690] sm:$0xff] }
  0x62   : > { %816 = vmatpush.bf16.msra.mxu0 %v509_v12  ;;  %v513_v37 = vpack.c.bf16 %v321_v35, %v257_v34  ;;  %v514_v40 = vpack.c.bf16 %v322_v39, %v258_v38  ;;  %v392_v43 = vld [vmem:[%s2734_s5 + $0x498] sm:$0xff]  ;;  %v583_v44 = vpack.c.bf16 %v455_v42, %v391_v41  ;;  %v389_v46 = vld [vmem:[%s2734_s5 + $0x480] sm:$0xff]  ;;  %v390_v50 = vld [vmem:[%s2734_s5 + $0x488] sm:$0xff] }
  0x63   : > { %852 = vmatpush.bf16.msra.mxu2 %v511_v7  ;;  %v456_v45 = vld [vmem:[%s2734_s5 + $0x698] sm:$0xff]  ;;  %v453_v47 = vld [vmem:[%s2734_s5 + $0x680] sm:$0xff]  ;;  %v454_v51 = vld [vmem:[%s2734_s5 + $0x688] sm:$0xff] }
  0x64   : > { %870 = vmatpush.bf16.msra.mxu3 %v512_v11  ;;  %834 = vmatpush.bf16.msra.mxu1 %v510_v15  ;;  %v584_v48 = vpack.c.bf16 %v456_v45, %v392_v43  ;;  %v581_v49 = vpack.c.bf16 %v453_v47, %v389_v46  ;;  %v582_v52 = vpack.c.bf16 %v454_v51, %v390_v50  ;;  %v263_v53 = vld [vmem:[%s2734_s5 + $0x90] sm:$0xff]  ;;  %v264_v55 = vld [vmem:[%s2734_s5 + $0x98] sm:$0xff]  ;;  %v261_v58 = vld [vmem:[%s2734_s5 + $0x80] sm:$0xff] }
  0x65   : > { %2156 = vmatmul.msk.bf16.gmra.mxu0 %vm658_vm0, %v2803_v3  ;;  %2158 = vmatmul.msk.bf16.gmra.mxu1 %vm658_vm0, %v2803_v3  ;;  %v327_v54 = vld [vmem:[%s2734_s5 + $0x290] sm:$0xff]  ;;  %v328_v57 = vld [vmem:[%s2734_s5 + $0x298] sm:$0xff]  ;;  %v325_v59 = vld [vmem:[%s2734_s5 + $0x280] sm:$0xff] }
  0x66   : > { %2160 = vmatmul.msk.bf16.gmra.mxu2 %vm658_vm0, %v2803_v3  ;;  %v519_v56 = vpack.c.bf16 %v327_v54, %v263_v53  ;;  %v520_v60 = vpack.c.bf16 %v328_v57, %v264_v55  ;;  %v517_v61 = vpack.c.bf16 %v325_v59, %v261_v58  ;;  %v262_v62 = vld [vmem:[%s2734_s5 + $0x88] sm:$0xff]  ;;  %v395_v1 = vld [vmem:[%s2734_s5 + $0x4b0] sm:$0xff]  ;;  %v396_v4 = vld [vmem:[%s2734_s5 + $0x4b8] sm:$0xff] }
  0x67   : > { %2162 = vmatmul.msk.bf16.gmra.mxu3 %vm658_vm0, %v2803_v3  ;;  %v326_v63 = vld [vmem:[%s2734_s5 + $0x288] sm:$0xff]  ;;  %v459_v2 = vld [vmem:[%s2734_s5 + $0x6b0] sm:$0xff]  ;;  %v460_v6 = vld [vmem:[%s2734_s5 + $0x6b8] sm:$0xff] }
  0x68   : > { %v518_v0 = vpack.c.bf16 %v326_v63, %v262_v62  ;;  %v587_v5 = vpack.c.bf16 %v459_v2, %v395_v1  ;;  %v588_v7 = vpack.c.bf16 %v460_v6, %v396_v4  ;;  %v393_v8 = vld [vmem:[%s2734_s5 + $0x4a0] sm:$0xff]  ;;  %v394_v10 = vld [vmem:[%s2734_s5 + $0x4a8] sm:$0xff]  ;;  %v267_v14 = vld [vmem:[%s2734_s5 + $0xb0] sm:$0xff] }
  0x69   : > { %v457_v9 = vld [vmem:[%s2734_s5 + $0x6a0] sm:$0xff]  ;;  %v458_v12 = vld [vmem:[%s2734_s5 + $0x6a8] sm:$0xff]  ;;  %v331_v15 = vld [vmem:[%s2734_s5 + $0x2b0] sm:$0xff] }
  0x6a   : > { %v585_v11 = vpack.c.bf16 %v457_v9, %v393_v8  ;;  %v586_v13 = vpack.c.bf16 %v458_v12, %v394_v10  ;;  %v268_v16 = vld [vmem:[%s2734_s5 + $0xb8] sm:$0xff]  ;;  %v523_v17 = vpack.c.bf16 %v331_v15, %v267_v14  ;;  %v265_v21 = vld [vmem:[%s2734_s5 + $0xa0] sm:$0xff]  ;;  %v330_v26 = vld [vmem:[%s2734_s5 + $0x2a8] sm:$0xff] }
  0x6b   : > { %v332_v18 = vld [vmem:[%s2734_s5 + $0x2b8] sm:$0xff]  ;;  %v329_v22 = vld [vmem:[%s2734_s5 + $0x2a0] sm:$0xff]  ;;  %v399_v34 = vld [vmem:[%s2734_s5 + $0x4d0] sm:$0xff] }
  0x6c   : > { %v463_v35 = vld [vmem:[%s2734_s5 + $0x6d0] sm:$0xff]  ;;  %v464_v39 = vld [vmem:[%s2734_s5 + $0x6d8] sm:$0xff]  ;;  %v397_v51 = vld [vmem:[%s2734_s5 + $0x4c0] sm:$0xff] }
  0x6d   : > { %v591_v38 = vpack.c.bf16 %v463_v35, %v399_v34  ;;  %v398_v53 = vld [vmem:[%s2734_s5 + $0x4c8] sm:$0xff]  ;;  %v271_v4 = vld [vmem:[%s2734_s5 + $0xd0] sm:$0xff]  ;;  %v272_v6 = vld [vmem:[%s2734_s5 + $0xd8] sm:$0xff] }
  0x6e   : > { %v336_v9 = vld [vmem:[%s2734_s5 + $0x2d8] sm:$0xff]  ;;  %v467_v34 = vld [vmem:[%s2734_s5 + $0x6f0] sm:$0xff] }
  0x6f   : > { %v404_v35 = vld [vmem:[%s2734_s5 + $0x4f8] sm:$0xff] }
  0x75   : > { %2163 = vmatmul.msk.bf16.vlgmr.msrb.gmra.mxu0 %vm658_vm0, %v2760_v24  ;;  %2165 = vmatmul.msk.bf16.vlgmr.msrb.gmra.mxu1 %vm658_vm0, %v2760_v24 }
  0x76   : > { %2167 = vmatmul.msk.bf16.vlgmr.msrb.gmra.mxu2 %vm658_vm0, %v2760_v24  ;;  %887 = vmatpush.bf16.msrb.mxu0 %v577_v25  ;;  %v521_v25 = vpack.c.bf16 %v329_v22, %v265_v21  ;;  %v334_v22 = vld [vmem:[%s2734_s5 + $0x2c8] sm:$0xff] }
  0x77   : > { %2169 = vmatmul.msk.bf16.vlgmr.msrb.gmra.mxu3 %vm658_vm0, %v2760_v24  ;;  %923 = vmatpush.bf16.msrb.mxu2 %v579_v19  ;;  %v524_v19 = vpack.c.bf16 %v332_v18, %v268_v16  ;;  %v333_v18 = vld [vmem:[%s2734_s5 + $0x2c0] sm:$0xff] }
  0x78   : > { %941 = vmatpush.bf16.msrb.mxu3 %v580_v23  ;;  %905 = vmatpush.bf16.msrb.mxu1 %v578_v28  ;;  %v266_v23 = vld [vmem:[%s2734_s5 + $0xa8] sm:$0xff] }
  0x79   : > { %v522_v27 = vpack.c.bf16 %v330_v26, %v266_v23 }
  0x7a   : > { %888 = vmatpush.bf16.msrb.mxu0 %v513_v37 }
  0x7b   : > { %924 = vmatpush.bf16.msrb.mxu2 %v515_v32 }
  0x7c   : > { %942 = vmatpush.bf16.msrb.mxu3 %v516_v36  ;;  %906 = vmatpush.bf16.msrb.mxu1 %v514_v40  ;;  %v400_v36 = vld [vmem:[%s2734_s5 + $0x4d8] sm:$0xff] }
  0x7d   : > { %v592_v43 = vpack.c.bf16 %v464_v39, %v400_v36 }
  0x85   : > { %2164 = vmatmul.msk.bf16.gmra.mxu0 %vm658_vm0, %v2803_v3  ;;  %2166 = vmatmul.msk.bf16.gmra.mxu1 %vm658_vm0, %v2803_v3 }
  0x86   : > { %2168 = vmatmul.msk.bf16.gmra.mxu2 %vm658_vm0, %v2803_v3 }
  0x87   : > { %2170 = vmatmul.msk.bf16.gmra.mxu3 %vm658_vm0, %v2803_v3 }
  0x95   : > { %2171 = vmatmul.msk.bf16.vlgmr.msra.gmra.mxu0 %vm658_vm0, %v2760_v24  ;;  %2173 = vmatmul.msk.bf16.vlgmr.msra.gmra.mxu1 %vm658_vm0, %v2760_v24 }
  0x96   : > { %2175 = vmatmul.msk.bf16.vlgmr.msra.gmra.mxu2 %vm658_vm0, %v2760_v24  ;;  %959 = vmatpush.bf16.msra.mxu0 %v581_v49 }
  0x97   : > { %2177 = vmatmul.msk.bf16.vlgmr.msra.gmra.mxu3 %vm658_vm0, %v2760_v24  ;;  %995 = vmatpush.bf16.msra.mxu2 %v583_v44 }
  0x98   : > { %1013 = vmatpush.bf16.msra.mxu3 %v584_v48  ;;  %977 = vmatpush.bf16.msra.mxu1 %v582_v52  ;;  %v461_v52 = vld [vmem:[%s2734_s5 + $0x6c0] sm:$0xff] }
  0x99   : > { %v589_v55 = vpack.c.bf16 %v461_v52, %v397_v51  ;;  %v465_v51 = vld [vmem:[%s2734_s5 + $0x6e0] sm:$0xff]  ;;  %v402_v52 = vld [vmem:[%s2734_s5 + $0x4e8] sm:$0xff] }
  0x9a   : > { %960 = vmatpush.bf16.msra.mxu0 %v517_v61 }
  0x9b   : > { %996 = vmatpush.bf16.msra.mxu2 %v519_v56  ;;  %v462_v56 = vld [vmem:[%s2734_s5 + $0x6c8] sm:$0xff] }
  0x9c   : > { %1014 = vmatpush.bf16.msra.mxu3 %v520_v60  ;;  %978 = vmatpush.bf16.msra.mxu1 %v518_v0  ;;  %v590_v60 = vpack.c.bf16 %v462_v56, %v398_v53 }
  0xa5   : > { %2172 = vmatmul.msk.bf16.gmra.mxu0 %vm658_vm0, %v2803_v3  ;;  %2174 = vmatmul.msk.bf16.gmra.mxu1 %vm658_vm0, %v2803_v3 }
  0xa6   : > { %2176 = vmatmul.msk.bf16.gmra.mxu2 %vm658_vm0, %v2803_v3 }
  0xa7   : > { %2178 = vmatmul.msk.bf16.gmra.mxu3 %vm658_vm0, %v2803_v3 }
  0xb5   : > { %2179 = vmatmul.msk.bf16.vlgmr.msrb.gmra.mxu0 %vm658_vm0, %v2760_v24  ;;  %2181 = vmatmul.msk.bf16.vlgmr.msrb.gmra.mxu1 %vm658_vm0, %v2760_v24 }
  0xb6   : > { %2183 = vmatmul.msk.bf16.vlgmr.msrb.gmra.mxu2 %vm658_vm0, %v2760_v24  ;;  %1031 = vmatpush.bf16.msrb.mxu0 %v585_v11 }
  0xb7   : > { %2185 = vmatmul.msk.bf16.vlgmr.msrb.gmra.mxu3 %vm658_vm0, %v2760_v24  ;;  %1067 = vmatpush.bf16.msrb.mxu2 %v587_v5  ;;  %v335_v5 = vld [vmem:[%s2734_s5 + $0x2d0] sm:$0xff] }
  0xb8   : > { %1085 = vmatpush.bf16.msrb.mxu3 %v588_v7  ;;  %1049 = vmatpush.bf16.msrb.mxu1 %v586_v13  ;;  %v527_v8 = vpack.c.bf16 %v335_v5, %v271_v4  ;;  %v528_v13 = vpack.c.bf16 %v336_v9, %v272_v6  ;;  %v339_v4 = vld [vmem:[%s2734_s5 + $0x2f0] sm:$0xff]  ;;  %v276_v5 = vld [vmem:[%s2734_s5 + $0xf8] sm:$0xff] }
  0xba   : > { %1032 = vmatpush.bf16.msrb.mxu0 %v521_v25 }
  0xbb   : > { %1068 = vmatpush.bf16.msrb.mxu2 %v523_v17  ;;  %v269_v17 = vld [vmem:[%s2734_s5 + $0xc0] sm:$0xff] }
  0xbc   : > { %1086 = vmatpush.bf16.msrb.mxu3 %v524_v19  ;;  %1050 = vmatpush.bf16.msrb.mxu1 %v522_v27  ;;  %v270_v19 = vld [vmem:[%s2734_s5 + $0xc8] sm:$0xff]  ;;  %v525_v21 = vpack.c.bf16 %v333_v18, %v269_v17  ;;  %v337_v17 = vld [vmem:[%s2734_s5 + $0x2e0] sm:$0xff] }
  0xbd   : > { %v526_v25 = vpack.c.bf16 %v334_v22, %v270_v19  ;;  %v274_v18 = vld [vmem:[%s2734_s5 + $0xe8] sm:$0xff] }
  0xc5   : > { %2180 = vmatmul.msk.bf16.gmra.mxu0 %vm658_vm0, %v2803_v3  ;;  %2182 = vmatmul.msk.bf16.gmra.mxu1 %vm658_vm0, %v2803_v3 }
  0xc6   : > { %2184 = vmatmul.msk.bf16.gmra.mxu2 %vm658_vm0, %v2803_v3  ;;  %v2913_v20 = vpop.permute.xlu0 %637 }
  0xc7   : > { %2186 = vmatmul.msk.bf16.gmra.mxu3 %vm658_vm0, %v2803_v3 }
  0xcb   : > { %v2945_v50 = vpop.permute.xlu1 %647 }
  0xcf   : > { %v2933_v33 = vpop.permute.xlu0 %642 }
  0xd2   : > { %v674_v28 = vpop.f32.mrf.mxu0  ;;  %v692_v30 = vpop.f32.mrf.mxu1 }
  0xd3   : > { %v675_v29 = vadd.f32 %v674_v28, %v2913_v20  ;;  %v693_v31 = vadd.f32 %v692_v30, %v2913_v20 }
  0xd5   : > { %2187 = vmatmul.msk.bf16.vlgmr.msra.gmra.mxu0 %vm658_vm0, %v2760_v24  ;;  %v1817_v32 = vpack.c.bf16 %v693_v31, %v675_v29  ;;  %2189 = vmatmul.msk.bf16.vlgmr.msra.gmra.mxu1 %vm658_vm0, %v2760_v24 }
  0xd6   : > { %2191 = vmatmul.msk.bf16.vlgmr.msra.gmra.mxu2 %vm658_vm0, %v2760_v24  ;;  %1103 = vmatpush.bf16.msra.mxu0 %v589_v55  ;;  %v466_v55 = vld [vmem:[%s2734_s5 + $0x6e8] sm:$0xff] }
  0xd7   : > { %2193 = vmatmul.msk.bf16.vlgmr.msra.gmra.mxu3 %vm658_vm0, %v2760_v24  ;;  %1913 = vst [vmem:[%s2930_s26] sm:$0xff] %v1817_v32  ;;  %1139 = vmatpush.bf16.msra.mxu2 %v591_v38  ;;  %v403_v32 = vld [vmem:[%s2734_s5 + $0x4f0] sm:$0xff]  ;;  %v468_v38 = vld [vmem:[%s2734_s5 + $0x6f8] sm:$0xff] }
  0xd8   : > { %1157 = vmatpush.bf16.msra.mxu3 %v592_v43  ;;  %1121 = vmatpush.bf16.msra.mxu1 %v590_v60 }
  0xd9   : > { %v710_v37 = vpop.f32.mrf.mxu2 }
  0xda   : > { %v711_v40 = vadd.f32 %v710_v37, %v2913_v20  ;;  %v728_v41 = vpop.f32.mrf.mxu3  ;;  %v676_v42 = vpop.f32.mrf.mxu0  ;;  %1104 = vmatpush.bf16.msra.mxu0 %v525_v21  ;;  %v595_v37 = vpack.c.bf16 %v467_v34, %v403_v32  ;;  %v338_v21 = vld [vmem:[%s2734_s5 + $0x2e8] sm:$0xff]  ;;  %v471_v32 = vld [vmem:[%s2734_s5 + $0x710] sm:$0xff]  ;;  %v408_v34 = vld [vmem:[%s2734_s5 + $0x518] sm:$0xff] }
  0xdb   : > { %v729_v44 = vadd.f32 %v728_v41, %v2913_v20  ;;  %v677_v45 = vadd.f32 %v676_v42, %v2933_v33  ;;  %v694_v46 = vpop.f32.mrf.mxu1  ;;  %1140 = vmatpush.bf16.msra.mxu2 %v527_v8  ;;  %v596_v42 = vpack.c.bf16 %v468_v38, %v404_v35  ;;  %v340_v8 = vld [vmem:[%s2734_s5 + $0x2f8] sm:$0xff] }
  0xdc   : > { %v695_v47 = vadd.f32 %v694_v46, %v2933_v33  ;;  %1158 = vmatpush.bf16.msra.mxu3 %v528_v13  ;;  %1122 = vmatpush.bf16.msra.mxu1 %v526_v25 }
  0xdd   : > { %v1818_v48 = vpack.c.bf16 %v729_v44, %v711_v40 }
  0xde   : > { %v1849_v49 = vpack.c.bf16 %v695_v47, %v677_v45 }
  0xdf   : > { %1914 = vst [vmem:[%s2930_s26 + $0x8] sm:$0xff] %v1818_v48 }
  0xe0   : > { %1945 = vst [vmem:[%s2930_s26 + $0x100] sm:$0xff] %v1849_v49  ;;  %v401_v49 = vld [vmem:[%s2734_s5 + $0x4e0] sm:$0xff] }
  0xe1   : > { %v712_v54 = vpop.f32.mrf.mxu2 }
  0xe2   : > { %v713_v57 = vadd.f32 %v712_v54, %v2933_v33  ;;  %v730_v58 = vpop.f32.mrf.mxu3  ;;  %v679_v59 = vpop.f32.mrf.mxu0  ;;  %v593_v54 = vpack.c.bf16 %v465_v51, %v401_v49  ;;  %v469_v49 = vld [vmem:[%s2734_s5 + $0x700] sm:$0xff]  ;;  %v406_v51 = vld [vmem:[%s2734_s5 + $0x508] sm:$0xff] }
  0xe3   : > { %v731_v61 = vadd.f32 %v730_v58, %v2933_v33  ;;  %v697_v62 = vpop.f32.mrf.mxu1  ;;  %v680_v63 = vadd.f32 %v679_v59, %v2945_v50  ;;  %v594_v59 = vpack.c.bf16 %v466_v55, %v402_v52 }
  0xe4   : > { %v698_v0 = vadd.f32 %v697_v62, %v2945_v50 }
  0xe5   : > { %v1850_v1 = vpack.c.bf16 %v731_v61, %v713_v57  ;;  %2188 = vmatmul.msk.bf16.gmra.mxu0 %vm658_vm0, %v2803_v3  ;;  %2190 = vmatmul.msk.bf16.gmra.mxu1 %vm658_vm0, %v2803_v3 }
  0xe6   : > { %2192 = vmatmul.msk.bf16.gmra.mxu2 %vm658_vm0, %v2803_v3  ;;  %v1881_v2 = vpack.c.bf16 %v698_v0, %v680_v63 }
  0xe7   : > { %1946 = vst [vmem:[%s2930_s26 + $0x108] sm:$0xff] %v1850_v1  ;;  %2194 = vmatmul.msk.bf16.gmra.mxu3 %vm658_vm0, %v2803_v3 }
  0xe8   : > { %1977 = vst [vmem:[%s2930_s26 + $0x200] sm:$0xff] %v1881_v2  ;;  %v275_v2 = vld [vmem:[%s2734_s5 + $0xf0] sm:$0xff] }
  0xe9   : > { %v715_v7 = vpop.f32.mrf.mxu2 }
  0xea   : > { %v716_v10 = vadd.f32 %v715_v7, %v2945_v50  ;;  %v733_v11 = vpop.f32.mrf.mxu3  ;;  %v681_v12 = vpop.f32.mrf.mxu0  ;;  %v531_v7 = vpack.c.bf16 %v339_v4, %v275_v2  ;;  %v343_v2 = vld [vmem:[%s2734_s5 + $0x310] sm:$0xff]  ;;  %v280_v4 = vld [vmem:[%s2734_s5 + $0x118] sm:$0xff] }
  0xeb   : > { %v734_v14 = vadd.f32 %v733_v11, %v2945_v50  ;;  %v699_v15 = vpop.f32.mrf.mxu1  ;;  %v532_v12 = vpack.c.bf16 %v340_v8, %v276_v5 }
  0xed   : > { %v1882_v16 = vpack.c.bf16 %v734_v14, %v716_v10 }
  0xef   : > { %1978 = vst [vmem:[%s2930_s26 + $0x208] sm:$0xff] %v1882_v16  ;;  %v273_v16 = vld [vmem:[%s2734_s5 + $0xe0] sm:$0xff] }
  0xf0   : > { %v529_v19 = vpack.c.bf16 %v337_v17, %v273_v16  ;;  %v341_v16 = vld [vmem:[%s2734_s5 + $0x300] sm:$0xff]  ;;  %v278_v17 = vld [vmem:[%s2734_s5 + $0x108] sm:$0xff] }
  0xf1   : > { %v717_v23 = vpop.f32.mrf.mxu2 }
  0xf2   : > { %v735_v26 = vpop.f32.mrf.mxu3  ;;  %v746_v27 = vpop.f32.mrf.mxu0  ;;  %v530_v23 = vpack.c.bf16 %v338_v21, %v274_v18 }
  0xf3   : > { %v747_v28 = vadd.f32 %v746_v27, %v2913_v20  ;;  %v764_v29 = vpop.f32.mrf.mxu1 }
  0xf4   : > { %v765_v30 = vadd.f32 %v764_v29, %v2913_v20 }
  0xf5   : > { %2195 = vmatmul.msk.bf16.vlgmr.msrb.gmra.mxu0 %vm658_vm0, %v2760_v24  ;;  %2197 = vmatmul.msk.bf16.vlgmr.msrb.gmra.mxu1 %vm658_vm0, %v2760_v24 }
  0xf6   : > { %v1819_v31 = vpack.c.bf16 %v765_v30, %v747_v28  ;;  %2199 = vmatmul.msk.bf16.vlgmr.msrb.gmra.mxu2 %vm658_vm0, %v2760_v24  ;;  %1175 = vmatpush.bf16.msrb.mxu0 %v593_v54  ;;  %v470_v54 = vld [vmem:[%s2734_s5 + $0x708] sm:$0xff] }
  0xf7   : > { %2201 = vmatmul.msk.bf16.vlgmr.msrb.gmra.mxu3 %vm658_vm0, %v2760_v24  ;;  %1211 = vmatpush.bf16.msrb.mxu2 %v595_v37  ;;  %v472_v37 = vld [vmem:[%s2734_s5 + $0x718] sm:$0xff] }
  0xf8   : > { %1915 = vst [vmem:[%s2930_s26 + $0x10] sm:$0xff] %v1819_v31  ;;  %1229 = vmatpush.bf16.msrb.mxu3 %v596_v42  ;;  %1193 = vmatpush.bf16.msrb.mxu1 %v594_v59  ;;  %v407_v31 = vld [vmem:[%s2734_s5 + $0x510] sm:$0xff] }
  0xf9   : > { %v782_v36 = vpop.f32.mrf.mxu2 }
  0xfa   : > { %v783_v39 = vadd.f32 %v782_v36, %v2913_v20  ;;  %v800_v40 = vpop.f32.mrf.mxu3  ;;  %v748_v41 = vpop.f32.mrf.mxu0  ;;  %1176 = vmatpush.bf16.msrb.mxu0 %v529_v19  ;;  %v599_v36 = vpack.c.bf16 %v471_v32, %v407_v31  ;;  %v342_v19 = vld [vmem:[%s2734_s5 + $0x308] sm:$0xff]  ;;  %v475_v31 = vld [vmem:[%s2734_s5 + $0x730] sm:$0xff]  ;;  %v412_v32 = vld [vmem:[%s2734_s5 + $0x538] sm:$0xff] }
  0xfb   : > { %v801_v43 = vadd.f32 %v800_v40, %v2913_v20  ;;  %v749_v44 = vadd.f32 %v748_v41, %v2933_v33  ;;  %v766_v45 = vpop.f32.mrf.mxu1  ;;  %1212 = vmatpush.bf16.msrb.mxu2 %v531_v7  ;;  %v600_v41 = vpack.c.bf16 %v472_v37, %v408_v34  ;;  %v344_v7 = vld [vmem:[%s2734_s5 + $0x318] sm:$0xff] }
  0xfc   : > { %v767_v46 = vadd.f32 %v766_v45, %v2933_v33  ;;  %1230 = vmatpush.bf16.msrb.mxu3 %v532_v12  ;;  %1194 = vmatpush.bf16.msrb.mxu1 %v530_v23 }
  0xfd   : > { %v1820_v47 = vpack.c.bf16 %v801_v43, %v783_v39 }
  0xfe   : > { %v1851_v48 = vpack.c.bf16 %v767_v46, %v749_v44 }
  0xff   : > { %1916 = vst [vmem:[%s2930_s26 + $0x18] sm:$0xff] %v1820_v47 }
 0x100   : > { %1947 = vst [vmem:[%s2930_s26 + $0x110] sm:$0xff] %v1851_v48  ;;  %v405_v48 = vld [vmem:[%s2734_s5 + $0x500] sm:$0xff] }
 0x101   : > { %v784_v53 = vpop.f32.mrf.mxu2 }
 0x102   : > { %v785_v56 = vadd.f32 %v784_v53, %v2933_v33  ;;  %v802_v57 = vpop.f32.mrf.mxu3  ;;  %v751_v58 = vpop.f32.mrf.mxu0  ;;  %v597_v53 = vpack.c.bf16 %v469_v49, %v405_v48  ;;  %v410_v48 = vld [vmem:[%s2734_s5 + $0x528] sm:$0xff] }
 0x103   : > { %v803_v60 = vadd.f32 %v802_v57, %v2933_v33  ;;  %v752_v61 = vadd.f32 %v751_v58, %v2945_v50  ;;  %v769_v62 = vpop.f32.mrf.mxu1  ;;  %v598_v58 = vpack.c.bf16 %v470_v54, %v406_v51 }
 0x104   : > { %v770_v63 = vadd.f32 %v769_v62, %v2945_v50 }
 0x105   : > { %v1852_v0 = vpack.c.bf16 %v803_v60, %v785_v56  ;;  %2196 = vmatmul.msk.bf16.gmra.mxu0 %vm658_vm0, %v2803_v3  ;;  %2198 = vmatmul.msk.bf16.gmra.mxu1 %vm658_vm0, %v2803_v3 }
 0x106   : > { %v1883_v1 = vpack.c.bf16 %v770_v63, %v752_v61  ;;  %2200 = vmatmul.msk.bf16.gmra.mxu2 %vm658_vm0, %v2803_v3 }
 0x107   : > { %1948 = vst [vmem:[%s2930_s26 + $0x118] sm:$0xff] %v1852_v0  ;;  %2202 = vmatmul.msk.bf16.gmra.mxu3 %vm658_vm0, %v2803_v3 }
 0x108   : > { %1979 = vst [vmem:[%s2930_s26 + $0x210] sm:$0xff] %v1883_v1  ;;  %v279_v1 = vld [vmem:[%s2734_s5 + $0x110] sm:$0xff] }
 0x109   : > { %v787_v6 = vpop.f32.mrf.mxu2 }
 0x10a   : > { %v788_v9 = vadd.f32 %v787_v6, %v2945_v50  ;;  %v805_v10 = vpop.f32.mrf.mxu3  ;;  %v753_v11 = vpop.f32.mrf.mxu0  ;;  %v535_v6 = vpack.c.bf16 %v343_v2, %v279_v1  ;;  %v284_v1 = vld [vmem:[%s2734_s5 + $0x138] sm:$0xff] }
 0x10b   : > { %v806_v13 = vadd.f32 %v805_v10, %v2945_v50  ;;  %v771_v14 = vpop.f32.mrf.mxu1  ;;  %v536_v11 = vpack.c.bf16 %v344_v7, %v280_v4 }
 0x10d   : > { %v1884_v15 = vpack.c.bf16 %v806_v13, %v788_v9 }
 0x10f   : > { %1980 = vst [vmem:[%s2930_s26 + $0x218] sm:$0xff] %v1884_v15  ;;  %v277_v15 = vld [vmem:[%s2734_s5 + $0x100] sm:$0xff] }
 0x110   : > { %v533_v18 = vpack.c.bf16 %v341_v16, %v277_v15  ;;  %v282_v15 = vld [vmem:[%s2734_s5 + $0x128] sm:$0xff] }
 0x111   : > { %v789_v22 = vpop.f32.mrf.mxu2 }
 0x112   : > { %v807_v25 = vpop.f32.mrf.mxu3  ;;  %v818_v26 = vpop.f32.mrf.mxu0  ;;  %v534_v22 = vpack.c.bf16 %v342_v19, %v278_v17  ;;  %v346_v17 = vld [vmem:[%s2734_s5 + $0x328] sm:$0xff] }
 0x113   : > { %v819_v27 = vadd.f32 %v818_v26, %v2913_v20  ;;  %v836_v28 = vpop.f32.mrf.mxu1  ;;  %v538_v19 = vpack.c.bf16 %v346_v17, %v282_v15 }
 0x114   : > { %v837_v29 = vadd.f32 %v836_v28, %v2913_v20 }
 0x115   : > { %2203 = vmatmul.msk.bf16.vlgmr.msra.gmra.mxu0 %vm658_vm0, %v2760_v24  ;;  %2205 = vmatmul.msk.bf16.vlgmr.msra.gmra.mxu1 %vm658_vm0, %v2760_v24 }
 0x116   : > { %v1821_v30 = vpack.c.bf16 %v837_v29, %v819_v27  ;;  %2207 = vmatmul.msk.bf16.vlgmr.msra.gmra.mxu2 %vm658_vm0, %v2760_v24  ;;  %1247 = vmatpush.bf16.msra.mxu0 %v597_v53 }
 0x117   : > { %2209 = vmatmul.msk.bf16.vlgmr.msra.gmra.mxu3 %vm658_vm0, %v2760_v24  ;;  %1283 = vmatpush.bf16.msra.mxu2 %v599_v36  ;;  %v476_v36 = vld [vmem:[%s2734_s5 + $0x738] sm:$0xff] }
 0x118   : > { %1917 = vst [vmem:[%s2930_s26 + $0x20] sm:$0xff] %v1821_v30  ;;  %1301 = vmatpush.bf16.msra.mxu3 %v600_v41  ;;  %1265 = vmatpush.bf16.msra.mxu1 %v598_v58  ;;  %v411_v30 = vld [vmem:[%s2734_s5 + $0x530] sm:$0xff] }
 0x119   : > { %v854_v35 = vpop.f32.mrf.mxu2 }
 0x11a   : > { %v855_v38 = vadd.f32 %v854_v35, %v2913_v20  ;;  %v872_v39 = vpop.f32.mrf.mxu3  ;;  %v820_v40 = vpop.f32.mrf.mxu0  ;;  %1248 = vmatpush.bf16.msra.mxu0 %v533_v18  ;;  %v603_v35 = vpack.c.bf16 %v475_v31, %v411_v30  ;;  %v479_v30 = vld [vmem:[%s2734_s5 + $0x750] sm:$0xff]  ;;  %v416_v31 = vld [vmem:[%s2734_s5 + $0x558] sm:$0xff] }
 0x11b   : > { %v873_v42 = vadd.f32 %v872_v39, %v2913_v20  ;;  %v821_v43 = vadd.f32 %v820_v40, %v2933_v33  ;;  %v838_v44 = vpop.f32.mrf.mxu1  ;;  %1284 = vmatpush.bf16.msra.mxu2 %v535_v6  ;;  %v604_v40 = vpack.c.bf16 %v476_v36, %v412_v32 }
 0x11c   : > { %v839_v45 = vadd.f32 %v838_v44, %v2933_v33  ;;  %1302 = vmatpush.bf16.msra.mxu3 %v536_v11  ;;  %1266 = vmatpush.bf16.msra.mxu1 %v534_v22 }
 0x11d   : > { %v1822_v46 = vpack.c.bf16 %v873_v42, %v855_v38 }
 0x11e   : > { %v1853_v47 = vpack.c.bf16 %v839_v45, %v821_v43 }
 0x11f   : > { %1918 = vst [vmem:[%s2930_s26 + $0x28] sm:$0xff] %v1822_v46  ;;  %v409_v46 = vld [vmem:[%s2734_s5 + $0x520] sm:$0xff] }
 0x120   : > { %1949 = vst [vmem:[%s2930_s26 + $0x120] sm:$0xff] %v1853_v47  ;;  %v473_v47 = vld [vmem:[%s2734_s5 + $0x720] sm:$0xff] }
 0x121   : > { %v856_v52 = vpop.f32.mrf.mxu2  ;;  %v601_v51 = vpack.c.bf16 %v473_v47, %v409_v46  ;;  %v477_v46 = vld [vmem:[%s2734_s5 + $0x740] sm:$0xff]  ;;  %v414_v47 = vld [vmem:[%s2734_s5 + $0x548] sm:$0xff] }
 0x122   : > { %v857_v55 = vadd.f32 %v856_v52, %v2933_v33  ;;  %v874_v56 = vpop.f32.mrf.mxu3  ;;  %v823_v57 = vpop.f32.mrf.mxu0  ;;  %v474_v52 = vld [vmem:[%s2734_s5 + $0x728] sm:$0xff] }
 0x123   : > { %v875_v59 = vadd.f32 %v874_v56, %v2933_v33  ;;  %v824_v60 = vadd.f32 %v823_v57, %v2945_v50  ;;  %v841_v61 = vpop.f32.mrf.mxu1  ;;  %v602_v56 = vpack.c.bf16 %v474_v52, %v410_v48 }
 0x124   : > { %v842_v62 = vadd.f32 %v841_v61, %v2945_v50 }
 0x125   : > { %v1854_v63 = vpack.c.bf16 %v875_v59, %v857_v55  ;;  %2204 = vmatmul.msk.bf16.gmra.mxu0 %vm658_vm0, %v2803_v3  ;;  %2206 = vmatmul.msk.bf16.gmra.mxu1 %vm658_vm0, %v2803_v3 }
 0x126   : > { %v1885_v0 = vpack.c.bf16 %v842_v62, %v824_v60  ;;  %2208 = vmatmul.msk.bf16.gmra.mxu2 %vm658_vm0, %v2803_v3 }
 0x127   : > { %1950 = vst [vmem:[%s2930_s26 + $0x128] sm:$0xff] %v1854_v63  ;;  %2210 = vmatmul.msk.bf16.gmra.mxu3 %vm658_vm0, %v2803_v3  ;;  %v283_v63 = vld [vmem:[%s2734_s5 + $0x130] sm:$0xff] }
 0x128   : > { %1981 = vst [vmem:[%s2930_s26 + $0x220] sm:$0xff] %v1885_v0  ;;  %v347_v0 = vld [vmem:[%s2734_s5 + $0x330] sm:$0xff] }
 0x129   : > { %v859_v5 = vpop.f32.mrf.mxu2  ;;  %v539_v4 = vpack.c.bf16 %v347_v0, %v283_v63  ;;  %v351_v63 = vld [vmem:[%s2734_s5 + $0x350] sm:$0xff]  ;;  %v288_v0 = vld [vmem:[%s2734_s5 + $0x158] sm:$0xff] }
 0x12a   : > { %v860_v8 = vadd.f32 %v859_v5, %v2945_v50  ;;  %v877_v9 = vpop.f32.mrf.mxu3  ;;  %v825_v10 = vpop.f32.mrf.mxu0  ;;  %v348_v5 = vld [vmem:[%s2734_s5 + $0x338] sm:$0xff] }
 0x12b   : > { %v878_v12 = vadd.f32 %v877_v9, %v2945_v50  ;;  %v843_v13 = vpop.f32.mrf.mxu1  ;;  %v540_v9 = vpack.c.bf16 %v348_v5, %v284_v1 }
 0x12c   : > { %v281_v13 = vld [vmem:[%s2734_s5 + $0x120] sm:$0xff] }
 0x12d   : > { %v1886_v14 = vpack.c.bf16 %v878_v12, %v860_v8 }
 0x12f   : > { %1982 = vst [vmem:[%s2930_s26 + $0x228] sm:$0xff] %v1886_v14  ;;  %v345_v14 = vld [vmem:[%s2734_s5 + $0x320] sm:$0xff] }
 0x130   : > { %v537_v16 = vpack.c.bf16 %v345_v14, %v281_v13  ;;  %v349_v13 = vld [vmem:[%s2734_s5 + $0x340] sm:$0xff]  ;;  %v286_v14 = vld [vmem:[%s2734_s5 + $0x148] sm:$0xff] }
 0x131   : > { %v861_v21 = vpop.f32.mrf.mxu2 }
 0x132   : > { %v879_v23 = vpop.f32.mrf.mxu3  ;;  %v890_v25 = vpop.f32.mrf.mxu0 }
 0x133   : > { %v891_v26 = vadd.f32 %v890_v25, %v2913_v20  ;;  %v908_v27 = vpop.f32.mrf.mxu1 }
 0x134   : > { %v909_v28 = vadd.f32 %v908_v27, %v2913_v20  ;;  %v3128_v27 = vld [vmem:[#allocation5] sm:$0xff] }
 0x135   : > { %2211 = vmatmul.msk.bf16.vlgmr.msrb.gmra.mxu0 %vm658_vm0, %v2760_v24  ;;  %2213 = vmatmul.msk.bf16.vlgmr.msrb.gmra.mxu1 %vm658_vm0, %v2760_v24 }
 0x136   : > { %v1823_v29 = vpack.c.bf16 %v909_v28, %v891_v26  ;;  %2215 = vmatmul.msk.bf16.vlgmr.msrb.gmra.mxu2 %vm658_vm0, %v2760_v24  ;;  %1319 = vmatpush.bf16.msrb.mxu0 %v601_v51  ;;  %v478_v51 = vld [vmem:[%s2734_s5 + $0x748] sm:$0xff] }
 0x137   : > { %2217 = vmatmul.msk.bf16.vlgmr.msrb.gmra.mxu3 %vm658_vm0, %v2760_v24  ;;  %1355 = vmatpush.bf16.msrb.mxu2 %v603_v35  ;;  %v480_v35 = vld [vmem:[%s2734_s5 + $0x758] sm:$0xff] }
 0x138   : > { %1919 = vst [vmem:[%s2930_s26 + $0x30] sm:$0xff] %v1823_v29  ;;  %1373 = vmatpush.bf16.msrb.mxu3 %v604_v40  ;;  %1337 = vmatpush.bf16.msrb.mxu1 %v602_v56  ;;  %v415_v29 = vld [vmem:[%s2734_s5 + $0x550] sm:$0xff] }
 0x139   : > { %v926_v34 = vpop.f32.mrf.mxu2 }
 0x13a   : > { %v927_v37 = vadd.f32 %v926_v34, %v2913_v20  ;;  %v944_v38 = vpop.f32.mrf.mxu3  ;;  %v892_v39 = vpop.f32.mrf.mxu0  ;;  %1320 = vmatpush.bf16.msrb.mxu0 %v537_v16  ;;  %v607_v34 = vpack.c.bf16 %v479_v30, %v415_v29  ;;  %v350_v16 = vld [vmem:[%s2734_s5 + $0x348] sm:$0xff]  ;;  %v483_v29 = vld [vmem:[%s2734_s5 + $0x770] sm:$0xff]  ;;  %v420_v30 = vld [vmem:[%s2734_s5 + $0x578] sm:$0xff] }
 0x13b   : > { %v945_v24 = vadd.f32 %v944_v38, %v2913_v20  ;;  %v893_v41 = vadd.f32 %v892_v39, %v2933_v33  ;;  %v910_v42 = vpop.f32.mrf.mxu1  ;;  %1356 = vmatpush.bf16.msrb.mxu2 %v539_v4  ;;  %v608_v39 = vpack.c.bf16 %v480_v35, %v416_v31  ;;  %v352_v4 = vld [vmem:[%s2734_s5 + $0x358] sm:$0xff] }
 0x13c   : > { %v911_v43 = vadd.f32 %v910_v42, %v2933_v33  ;;  %1374 = vmatpush.bf16.msrb.mxu3 %v540_v9  ;;  %1338 = vmatpush.bf16.msrb.mxu1 %v538_v19 }
 0x13d   : > { %v1824_v44 = vpack.c.bf16 %v945_v24, %v927_v37 }
 0x13e   : > { %v1855_v45 = vpack.c.bf16 %v911_v43, %v893_v41 }
 0x13f   : > { %1920 = vst [vmem:[%s2930_s26 + $0x38] sm:$0xff] %v1824_v44 }
 0x140   : > { %1951 = vst [vmem:[%s2930_s26 + $0x130] sm:$0xff] %v1855_v45  ;;  %v413_v45 = vld [vmem:[%s2734_s5 + $0x540] sm:$0xff] }
 0x141   : > { %v928_v49 = vpop.f32.mrf.mxu2 }
 0x142   : > { %v929_v53 = vadd.f32 %v928_v49, %v2933_v33  ;;  %v946_v54 = vpop.f32.mrf.mxu3  ;;  %v895_v55 = vpop.f32.mrf.mxu0  ;;  %v605_v49 = vpack.c.bf16 %v477_v46, %v413_v45  ;;  %v481_v45 = vld [vmem:[%s2734_s5 + $0x760] sm:$0xff]  ;;  %v418_v46 = vld [vmem:[%s2734_s5 + $0x568] sm:$0xff] }
 0x143   : > { %v947_v57 = vadd.f32 %v946_v54, %v2933_v33  ;;  %v896_v58 = vadd.f32 %v895_v55, %v2945_v50  ;;  %v913_v59 = vpop.f32.mrf.mxu1  ;;  %v606_v55 = vpack.c.bf16 %v478_v51, %v414_v47 }
 0x144   : > { %v914_v60 = vadd.f32 %v913_v59, %v2945_v50 }
 0x145   : > { %v1856_v61 = vpack.c.bf16 %v947_v57, %v929_v53  ;;  %2212 = vmatmul.msk.bf16.gmra.mxu0 %vm658_vm0, %v2803_v3  ;;  %2214 = vmatmul.msk.bf16.gmra.mxu1 %vm658_vm0, %v2803_v3 }
 0x146   : > { %v1887_v62 = vpack.c.bf16 %v914_v60, %v896_v58  ;;  %2216 = vmatmul.msk.bf16.gmra.mxu2 %vm658_vm0, %v2803_v3 }
 0x147   : > { %1952 = vst [vmem:[%s2930_s26 + $0x138] sm:$0xff] %v1856_v61  ;;  %2218 = vmatmul.msk.bf16.gmra.mxu3 %vm658_vm0, %v2803_v3 }
 0x148   : > { %1983 = vst [vmem:[%s2930_s26 + $0x230] sm:$0xff] %v1887_v62  ;;  %v287_v62 = vld [vmem:[%s2734_s5 + $0x150] sm:$0xff] }
 0x149   : > { %v931_v2 = vpop.f32.mrf.mxu2 }
 0x14a   : > { %v932_v6 = vadd.f32 %v931_v2, %v2945_v50  ;;  %v949_v7 = vpop.f32.mrf.mxu3  ;;  %v897_v8 = vpop.f32.mrf.mxu0  ;;  %v543_v2 = vpack.c.bf16 %v351_v63, %v287_v62  ;;  %v355_v62 = vld [vmem:[%s2734_s5 + $0x370] sm:$0xff]  ;;  %v292_v63 = vld [vmem:[%s2734_s5 + $0x178] sm:$0xff] }
 0x14b   : > { %v950_v10 = vadd.f32 %v949_v7, %v2945_v50  ;;  %v915_v11 = vpop.f32.mrf.mxu1  ;;  %v544_v8 = vpack.c.bf16 %v352_v4, %v288_v0 }
 0x14d   : > { %v1888_v12 = vpack.c.bf16 %v950_v10, %v932_v6 }
 0x14f   : > { %1984 = vst [vmem:[%s2930_s26 + $0x238] sm:$0xff] %v1888_v12  ;;  %v285_v12 = vld [vmem:[%s2734_s5 + $0x140] sm:$0xff] }
 0x150   : > { %v541_v15 = vpack.c.bf16 %v349_v13, %v285_v12  ;;  %v353_v12 = vld [vmem:[%s2734_s5 + $0x360] sm:$0xff]  ;;  %v290_v13 = vld [vmem:[%s2734_s5 + $0x168] sm:$0xff] }
 0x151   : > { %v933_v18 = vpop.f32.mrf.mxu2 }
 0x152   : > { %v951_v21 = vpop.f32.mrf.mxu3  ;;  %v962_v22 = vpop.f32.mrf.mxu0  ;;  %v542_v18 = vpack.c.bf16 %v350_v16, %v286_v14 }
 0x153   : > { %v963_v23 = vadd.f32 %v962_v22, %v2913_v20  ;;  %v980_v25 = vpop.f32.mrf.mxu1 }
 0x154   : > { %v981_v26 = vadd.f32 %v980_v25, %v2913_v20 }
 0x155   : > { %2219 = vmatmul.msk.bf16.vlgmr.msra.gmra.mxu0 %vm658_vm0, %v3128_v27  ;;  %2221 = vmatmul.msk.bf16.vlgmr.msra.gmra.mxu1 %vm658_vm0, %v3128_v27 }
 0x156   : > { %v1825_v28 = vpack.c.bf16 %v981_v26, %v963_v23  ;;  %2223 = vmatmul.msk.bf16.vlgmr.msra.gmra.mxu2 %vm658_vm0, %v3128_v27  ;;  %1391 = vmatpush.bf16.msra.mxu0 %v605_v49  ;;  %v482_v49 = vld [vmem:[%s2734_s5 + $0x768] sm:$0xff] }
 0x157   : > { %2225 = vmatmul.msk.bf16.vlgmr.msra.gmra.mxu3 %vm658_vm0, %v3128_v27  ;;  %1427 = vmatpush.bf16.msra.mxu2 %v607_v34  ;;  %v484_v34 = vld [vmem:[%s2734_s5 + $0x778] sm:$0xff] }
 0x158   : > { %1921 = vst [vmem:[%s2930_s26 + $0x40] sm:$0xff] %v1825_v28  ;;  %1445 = vmatpush.bf16.msra.mxu3 %v608_v39  ;;  %1409 = vmatpush.bf16.msra.mxu1 %v606_v55  ;;  %v419_v28 = vld [vmem:[%s2734_s5 + $0x570] sm:$0xff] }
 0x159   : > { %v998_v32 = vpop.f32.mrf.mxu2 }
 0x15a   : > { %v999_v36 = vadd.f32 %v998_v32, %v2913_v20  ;;  %v1016_v37 = vpop.f32.mrf.mxu3  ;;  %v964_v38 = vpop.f32.mrf.mxu0  ;;  %1392 = vmatpush.bf16.msra.mxu0 %v541_v15  ;;  %v611_v32 = vpack.c.bf16 %v483_v29, %v419_v28  ;;  %v354_v15 = vld [vmem:[%s2734_s5 + $0x368] sm:$0xff]  ;;  %v487_v28 = vld [vmem:[%s2734_s5 + $0x790] sm:$0xff]  ;;  %v424_v29 = vld [vmem:[%s2734_s5 + $0x598] sm:$0xff] }
 0x15b   : > { %v1017_v40 = vadd.f32 %v1016_v37, %v2913_v20  ;;  %v965_v24 = vadd.f32 %v964_v38, %v2933_v33  ;;  %v982_v41 = vpop.f32.mrf.mxu1  ;;  %1428 = vmatpush.bf16.msra.mxu2 %v543_v2  ;;  %v612_v38 = vpack.c.bf16 %v484_v34, %v420_v30  ;;  %v356_v2 = vld [vmem:[%s2734_s5 + $0x378] sm:$0xff] }
 0x15c   : > { %v983_v42 = vadd.f32 %v982_v41, %v2933_v33  ;;  %1446 = vmatpush.bf16.msra.mxu3 %v544_v8  ;;  %1410 = vmatpush.bf16.msra.mxu1 %v542_v18 }
 0x15d   : > { %v1826_v43 = vpack.c.bf16 %v1017_v40, %v999_v36 }
 0x15e   : > { %v1857_v44 = vpack.c.bf16 %v983_v42, %v965_v24 }
 0x15f   : > { %1922 = vst [vmem:[%s2930_s26 + $0x48] sm:$0xff] %v1826_v43 }
 0x160   : > { %1953 = vst [vmem:[%s2930_s26 + $0x140] sm:$0xff] %v1857_v44  ;;  %v417_v44 = vld [vmem:[%s2734_s5 + $0x560] sm:$0xff] }
 0x161   : > { %v1000_v48 = vpop.f32.mrf.mxu2 }
 0x162   : > { %v1001_v52 = vadd.f32 %v1000_v48, %v2933_v33  ;;  %v1018_v53 = vpop.f32.mrf.mxu3  ;;  %v967_v54 = vpop.f32.mrf.mxu0  ;;  %v609_v48 = vpack.c.bf16 %v481_v45, %v417_v44  ;;  %v485_v44 = vld [vmem:[%s2734_s5 + $0x780] sm:$0xff]  ;;  %v422_v45 = vld [vmem:[%s2734_s5 + $0x588] sm:$0xff] }
 0x163   : > { %v1019_v56 = vadd.f32 %v1018_v53, %v2933_v33  ;;  %v968_v57 = vadd.f32 %v967_v54, %v2945_v50  ;;  %v985_v58 = vpop.f32.mrf.mxu1  ;;  %v610_v54 = vpack.c.bf16 %v482_v49, %v418_v46 }
 0x164   : > { %v986_v59 = vadd.f32 %v985_v58, %v2945_v50 }
 0x165   : > { %v1858_v60 = vpack.c.bf16 %v1019_v56, %v1001_v52  ;;  %2220 = vmatmul.msk.bf16.gmra.mxu0 %vm658_vm0, %v2803_v3  ;;  %2222 = vmatmul.msk.bf16.gmra.mxu1 %vm658_vm0, %v2803_v3 }
 0x166   : > { %v1889_v61 = vpack.c.bf16 %v986_v59, %v968_v57  ;;  %2224 = vmatmul.msk.bf16.gmra.mxu2 %vm658_vm0, %v2803_v3 }
 0x167   : > { %1954 = vst [vmem:[%s2930_s26 + $0x148] sm:$0xff] %v1858_v60  ;;  %2226 = vmatmul.msk.bf16.gmra.mxu3 %vm658_vm0, %v2803_v3 }
 0x168   : > { %1985 = vst [vmem:[%s2930_s26 + $0x240] sm:$0xff] %v1889_v61  ;;  %v291_v61 = vld [vmem:[%s2734_s5 + $0x170] sm:$0xff] }
 0x169   : > { %v1003_v1 = vpop.f32.mrf.mxu2 }
 0x16a   : > { %v1004_v5 = vadd.f32 %v1003_v1, %v2945_v50  ;;  %v1021_v6 = vpop.f32.mrf.mxu3  ;;  %v969_v7 = vpop.f32.mrf.mxu0  ;;  %v547_v1 = vpack.c.bf16 %v355_v62, %v291_v61  ;;  %v359_v61 = vld [vmem:[%s2734_s5 + $0x390] sm:$0xff]  ;;  %v296_v62 = vld [vmem:[%s2734_s5 + $0x198] sm:$0xff] }
 0x16b   : > { %v1022_v9 = vadd.f32 %v1021_v6, %v2945_v50  ;;  %v987_v10 = vpop.f32.mrf.mxu1  ;;  %v548_v7 = vpack.c.bf16 %v356_v2, %v292_v63 }
 0x16d   : > { %v1890_v11 = vpack.c.bf16 %v1022_v9, %v1004_v5 }
 0x16f   : > { %1986 = vst [vmem:[%s2930_s26 + $0x248] sm:$0xff] %v1890_v11  ;;  %v289_v11 = vld [vmem:[%s2734_s5 + $0x160] sm:$0xff] }
 0x170   : > { %v545_v14 = vpack.c.bf16 %v353_v12, %v289_v11  ;;  %v357_v11 = vld [vmem:[%s2734_s5 + $0x380] sm:$0xff]  ;;  %v294_v12 = vld [vmem:[%s2734_s5 + $0x188] sm:$0xff] }
 0x171   : > { %v1005_v17 = vpop.f32.mrf.mxu2 }
 0x172   : > { %v1023_v19 = vpop.f32.mrf.mxu3  ;;  %v1034_v21 = vpop.f32.mrf.mxu0  ;;  %v546_v17 = vpack.c.bf16 %v354_v15, %v290_v13 }
 0x173   : > { %v1035_v22 = vadd.f32 %v1034_v21, %v2913_v20  ;;  %v1052_v23 = vpop.f32.mrf.mxu1 }
 0x174   : > { %v1053_v25 = vadd.f32 %v1052_v23, %v2913_v20 }
 0x175   : > { %2227 = vmatmul.msk.bf16.vlgmr.msrb.gmra.mxu0 %vm658_vm0, %v3128_v27  ;;  %2229 = vmatmul.msk.bf16.vlgmr.msrb.gmra.mxu1 %vm658_vm0, %v3128_v27 }
 0x176   : > { %v1827_v26 = vpack.c.bf16 %v1053_v25, %v1035_v22  ;;  %2231 = vmatmul.msk.bf16.vlgmr.msrb.gmra.mxu2 %vm658_vm0, %v3128_v27  ;;  %1463 = vmatpush.bf16.msrb.mxu0 %v609_v48  ;;  %v486_v48 = vld [vmem:[%s2734_s5 + $0x788] sm:$0xff] }
 0x177   : > { %2233 = vmatmul.msk.bf16.vlgmr.msrb.gmra.mxu3 %vm658_vm0, %v3128_v27  ;;  %1499 = vmatpush.bf16.msrb.mxu2 %v611_v32  ;;  %v488_v32 = vld [vmem:[%s2734_s5 + $0x798] sm:$0xff] }
 0x178   : > { %1923 = vst [vmem:[%s2930_s26 + $0x50] sm:$0xff] %v1827_v26  ;;  %1517 = vmatpush.bf16.msrb.mxu3 %v612_v38  ;;  %1481 = vmatpush.bf16.msrb.mxu1 %v610_v54  ;;  %v423_v26 = vld [vmem:[%s2734_s5 + $0x590] sm:$0xff] }
 0x179   : > { %v1070_v31 = vpop.f32.mrf.mxu2 }
 0x17a   : > { %v1071_v35 = vadd.f32 %v1070_v31, %v2913_v20  ;;  %v1088_v36 = vpop.f32.mrf.mxu3  ;;  %v1036_v37 = vpop.f32.mrf.mxu0  ;;  %1464 = vmatpush.bf16.msrb.mxu0 %v545_v14  ;;  %v615_v31 = vpack.c.bf16 %v487_v28, %v423_v26  ;;  %v358_v14 = vld [vmem:[%s2734_s5 + $0x388] sm:$0xff]  ;;  %v491_v26 = vld [vmem:[%s2734_s5 + $0x7b0] sm:$0xff]  ;;  %v428_v28 = vld [vmem:[%s2734_s5 + $0x5b8] sm:$0xff] }
 0x17b   : > { %v1089_v39 = vadd.f32 %v1088_v36, %v2913_v20  ;;  %v1037_v40 = vadd.f32 %v1036_v37, %v2933_v33  ;;  %v1054_v24 = vpop.f32.mrf.mxu1  ;;  %1500 = vmatpush.bf16.msrb.mxu2 %v547_v1  ;;  %v616_v37 = vpack.c.bf16 %v488_v32, %v424_v29  ;;  %v360_v1 = vld [vmem:[%s2734_s5 + $0x398] sm:$0xff] }
 0x17c   : > { %v1055_v41 = vadd.f32 %v1054_v24, %v2933_v33  ;;  %1518 = vmatpush.bf16.msrb.mxu3 %v548_v7  ;;  %1482 = vmatpush.bf16.msrb.mxu1 %v546_v17 }
 0x17d   : > { %v1828_v42 = vpack.c.bf16 %v1089_v39, %v1071_v35 }
 0x17e   : > { %v1859_v43 = vpack.c.bf16 %v1055_v41, %v1037_v40 }
 0x17f   : > { %1924 = vst [vmem:[%s2930_s26 + $0x58] sm:$0xff] %v1828_v42 }
 0x180   : > { %1955 = vst [vmem:[%s2930_s26 + $0x150] sm:$0xff] %v1859_v43  ;;  %v421_v43 = vld [vmem:[%s2734_s5 + $0x580] sm:$0xff] }
 0x181   : > { %v1072_v47 = vpop.f32.mrf.mxu2 }
 0x182   : > { %v1073_v51 = vadd.f32 %v1072_v47, %v2933_v33  ;;  %v1090_v52 = vpop.f32.mrf.mxu3  ;;  %v1039_v53 = vpop.f32.mrf.mxu0  ;;  %v613_v47 = vpack.c.bf16 %v485_v44, %v421_v43  ;;  %v489_v43 = vld [vmem:[%s2734_s5 + $0x7a0] sm:$0xff]  ;;  %v426_v44 = vld [vmem:[%s2734_s5 + $0x5a8] sm:$0xff] }
 0x183   : > { %v1091_v55 = vadd.f32 %v1090_v52, %v2933_v33  ;;  %v1040_v56 = vadd.f32 %v1039_v53, %v2945_v50  ;;  %v1057_v57 = vpop.f32.mrf.mxu1  ;;  %v614_v53 = vpack.c.bf16 %v486_v48, %v422_v45 }
 0x184   : > { %v1058_v58 = vadd.f32 %v1057_v57, %v2945_v50 }
 0x185   : > { %v1860_v59 = vpack.c.bf16 %v1091_v55, %v1073_v51  ;;  %2228 = vmatmul.msk.bf16.gmra.mxu0 %vm658_vm0, %v2803_v3  ;;  %2230 = vmatmul.msk.bf16.gmra.mxu1 %vm658_vm0, %v2803_v3 }
 0x186   : > { %v1891_v60 = vpack.c.bf16 %v1058_v58, %v1040_v56  ;;  %2232 = vmatmul.msk.bf16.gmra.mxu2 %vm658_vm0, %v2803_v3 }
 0x187   : > { %1956 = vst [vmem:[%s2930_s26 + $0x158] sm:$0xff] %v1860_v59  ;;  %2234 = vmatmul.msk.bf16.gmra.mxu3 %vm658_vm0, %v2803_v3 }
 0x188   : > { %1987 = vst [vmem:[%s2930_s26 + $0x250] sm:$0xff] %v1891_v60  ;;  %v295_v60 = vld [vmem:[%s2734_s5 + $0x190] sm:$0xff] }
 0x189   : > { %v1075_v0 = vpop.f32.mrf.mxu2 }
 0x18a   : > { %v1076_v4 = vadd.f32 %v1075_v0, %v2945_v50  ;;  %v1093_v5 = vpop.f32.mrf.mxu3  ;;  %v1041_v6 = vpop.f32.mrf.mxu0  ;;  %v551_v0 = vpack.c.bf16 %v359_v61, %v295_v60  ;;  %v363_v60 = vld [vmem:[%s2734_s5 + $0x3b0] sm:$0xff]  ;;  %v300_v61 = vld [vmem:[%s2734_s5 + $0x1b8] sm:$0xff] }
 0x18b   : > { %v1094_v8 = vadd.f32 %v1093_v5, %v2945_v50  ;;  %v1059_v9 = vpop.f32.mrf.mxu1  ;;  %v552_v6 = vpack.c.bf16 %v360_v1, %v296_v62 }
 0x18d   : > { %v1892_v10 = vpack.c.bf16 %v1094_v8, %v1076_v4 }
 0x18f   : > { %1988 = vst [vmem:[%s2930_s26 + $0x258] sm:$0xff] %v1892_v10  ;;  %v293_v10 = vld [vmem:[%s2734_s5 + $0x180] sm:$0xff] }
 0x190   : > { %v549_v13 = vpack.c.bf16 %v357_v11, %v293_v10  ;;  %v361_v10 = vld [vmem:[%s2734_s5 + $0x3a0] sm:$0xff]  ;;  %v298_v11 = vld [vmem:[%s2734_s5 + $0x1a8] sm:$0xff] }
 0x191   : > { %v1077_v16 = vpop.f32.mrf.mxu2 }
 0x192   : > { %v1095_v18 = vpop.f32.mrf.mxu3  ;;  %v1106_v19 = vpop.f32.mrf.mxu0  ;;  %v550_v16 = vpack.c.bf16 %v358_v14, %v294_v12 }
 0x193   : > { %v1107_v21 = vadd.f32 %v1106_v19, %v2913_v20  ;;  %v1124_v22 = vpop.f32.mrf.mxu1 }
 0x194   : > { %v1125_v23 = vadd.f32 %v1124_v22, %v2913_v20 }
 0x195   : > { %2235 = vmatmul.msk.bf16.vlgmr.msra.gmra.mxu0 %vm658_vm0, %v3128_v27  ;;  %2237 = vmatmul.msk.bf16.vlgmr.msra.gmra.mxu1 %vm658_vm0, %v3128_v27 }
 0x196   : > { %v1829_v25 = vpack.c.bf16 %v1125_v23, %v1107_v21  ;;  %2239 = vmatmul.msk.bf16.vlgmr.msra.gmra.mxu2 %vm658_vm0, %v3128_v27  ;;  %1535 = vmatpush.bf16.msra.mxu0 %v613_v47  ;;  %v490_v47 = vld [vmem:[%s2734_s5 + $0x7a8] sm:$0xff] }
 0x197   : > { %2241 = vmatmul.msk.bf16.vlgmr.msra.gmra.mxu3 %vm658_vm0, %v3128_v27  ;;  %1571 = vmatpush.bf16.msra.mxu2 %v615_v31  ;;  %v492_v31 = vld [vmem:[%s2734_s5 + $0x7b8] sm:$0xff] }
 0x198   : > { %1925 = vst [vmem:[%s2930_s26 + $0x60] sm:$0xff] %v1829_v25  ;;  %1589 = vmatpush.bf16.msra.mxu3 %v616_v37  ;;  %1553 = vmatpush.bf16.msra.mxu1 %v614_v53  ;;  %v427_v25 = vld [vmem:[%s2734_s5 + $0x5b0] sm:$0xff] }
 0x199   : > { %v1142_v30 = vpop.f32.mrf.mxu2 }
 0x19a   : > { %v1143_v34 = vadd.f32 %v1142_v30, %v2913_v20  ;;  %v1160_v35 = vpop.f32.mrf.mxu3  ;;  %v1108_v36 = vpop.f32.mrf.mxu0  ;;  %1536 = vmatpush.bf16.msra.mxu0 %v549_v13  ;;  %v619_v30 = vpack.c.bf16 %v491_v26, %v427_v25  ;;  %v362_v13 = vld [vmem:[%s2734_s5 + $0x3a8] sm:$0xff]  ;;  %v495_v25 = vld [vmem:[%s2734_s5 + $0x7d0] sm:$0xff]  ;;  %v432_v26 = vld [vmem:[%s2734_s5 + $0x5d8] sm:$0xff] }
 0x19b   : > { %v1161_v38 = vadd.f32 %v1160_v35, %v2913_v20  ;;  %v1109_v39 = vadd.f32 %v1108_v36, %v2933_v33  ;;  %v1126_v40 = vpop.f32.mrf.mxu1  ;;  %1572 = vmatpush.bf16.msra.mxu2 %v551_v0  ;;  %v620_v36 = vpack.c.bf16 %v492_v31, %v428_v28  ;;  %v364_v0 = vld [vmem:[%s2734_s5 + $0x3b8] sm:$0xff] }
 0x19c   : > { %v1127_v24 = vadd.f32 %v1126_v40, %v2933_v33  ;;  %1590 = vmatpush.bf16.msra.mxu3 %v552_v6  ;;  %1554 = vmatpush.bf16.msra.mxu1 %v550_v16 }
 0x19d   : > { %v1830_v41 = vpack.c.bf16 %v1161_v38, %v1143_v34 }
 0x19e   : > { %v1861_v42 = vpack.c.bf16 %v1127_v24, %v1109_v39 }
 0x19f   : > { %1926 = vst [vmem:[%s2930_s26 + $0x68] sm:$0xff] %v1830_v41 }
 0x1a0   : > { %1957 = vst [vmem:[%s2930_s26 + $0x160] sm:$0xff] %v1861_v42  ;;  %v425_v42 = vld [vmem:[%s2734_s5 + $0x5a0] sm:$0xff] }
 0x1a1   : > { %v1144_v46 = vpop.f32.mrf.mxu2 }
 0x1a2   : > { %v1145_v49 = vadd.f32 %v1144_v46, %v2933_v33  ;;  %v1162_v51 = vpop.f32.mrf.mxu3  ;;  %v1111_v52 = vpop.f32.mrf.mxu0  ;;  %v617_v46 = vpack.c.bf16 %v489_v43, %v425_v42  ;;  %v493_v42 = vld [vmem:[%s2734_s5 + $0x7c0] sm:$0xff]  ;;  %v430_v43 = vld [vmem:[%s2734_s5 + $0x5c8] sm:$0xff] }
 0x1a3   : > { %v1163_v54 = vadd.f32 %v1162_v51, %v2933_v33  ;;  %v1112_v55 = vadd.f32 %v1111_v52, %v2945_v50  ;;  %v1129_v56 = vpop.f32.mrf.mxu1  ;;  %v618_v52 = vpack.c.bf16 %v490_v47, %v426_v44 }
 0x1a4   : > { %v1130_v57 = vadd.f32 %v1129_v56, %v2945_v50 }
 0x1a5   : > { %v1862_v58 = vpack.c.bf16 %v1163_v54, %v1145_v49  ;;  %2236 = vmatmul.msk.bf16.gmra.mxu0 %vm658_vm0, %v2803_v3  ;;  %2238 = vmatmul.msk.bf16.gmra.mxu1 %vm658_vm0, %v2803_v3 }
 0x1a6   : > { %v1893_v59 = vpack.c.bf16 %v1130_v57, %v1112_v55  ;;  %2240 = vmatmul.msk.bf16.gmra.mxu2 %vm658_vm0, %v2803_v3 }
 0x1a7   : > { %1958 = vst [vmem:[%s2930_s26 + $0x168] sm:$0xff] %v1862_v58  ;;  %2242 = vmatmul.msk.bf16.gmra.mxu3 %vm658_vm0, %v2803_v3 }
 0x1a8   : > { %1989 = vst [vmem:[%s2930_s26 + $0x260] sm:$0xff] %v1893_v59  ;;  %v299_v59 = vld [vmem:[%s2734_s5 + $0x1b0] sm:$0xff] }
 0x1a9   : > { %v1147_v63 = vpop.f32.mrf.mxu2 }
 0x1aa   : > { %v1148_v2 = vadd.f32 %v1147_v63, %v2945_v50  ;;  %v1165_v4 = vpop.f32.mrf.mxu3  ;;  %v1113_v5 = vpop.f32.mrf.mxu0  ;;  %v555_v63 = vpack.c.bf16 %v363_v60, %v299_v59  ;;  %v367_v59 = vld [vmem:[%s2734_s5 + $0x3d0] sm:$0xff]  ;;  %v304_v60 = vld [vmem:[%s2734_s5 + $0x1d8] sm:$0xff] }
 0x1ab   : > { %v1166_v7 = vadd.f32 %v1165_v4, %v2945_v50  ;;  %v1131_v8 = vpop.f32.mrf.mxu1  ;;  %v556_v5 = vpack.c.bf16 %v364_v0, %v300_v61 }
 0x1ad   : > { %v1894_v9 = vpack.c.bf16 %v1166_v7, %v1148_v2 }
 0x1af   : > { %1990 = vst [vmem:[%s2930_s26 + $0x268] sm:$0xff] %v1894_v9  ;;  %v297_v9 = vld [vmem:[%s2734_s5 + $0x1a0] sm:$0xff] }
 0x1b0   : > { %v553_v12 = vpack.c.bf16 %v361_v10, %v297_v9  ;;  %v365_v9 = vld [vmem:[%s2734_s5 + $0x3c0] sm:$0xff]  ;;  %v302_v10 = vld [vmem:[%s2734_s5 + $0x1c8] sm:$0xff] }
 0x1b1   : > { %v1149_v15 = vpop.f32.mrf.mxu2 }
 0x1b2   : > { %v1167_v17 = vpop.f32.mrf.mxu3  ;;  %v1178_v18 = vpop.f32.mrf.mxu0  ;;  %v554_v15 = vpack.c.bf16 %v362_v13, %v298_v11 }
 0x1b3   : > { %v1179_v19 = vadd.f32 %v1178_v18, %v2913_v20  ;;  %v1196_v21 = vpop.f32.mrf.mxu1 }
 0x1b4   : > { %v1197_v22 = vadd.f32 %v1196_v21, %v2913_v20 }
 0x1b5   : > { %2243 = vmatmul.msk.bf16.vlgmr.msrb.gmra.mxu0 %vm658_vm0, %v3128_v27  ;;  %2245 = vmatmul.msk.bf16.vlgmr.msrb.gmra.mxu1 %vm658_vm0, %v3128_v27 }
 0x1b6   : > { %v1831_v23 = vpack.c.bf16 %v1197_v22, %v1179_v19  ;;  %2247 = vmatmul.msk.bf16.vlgmr.msrb.gmra.mxu2 %vm658_vm0, %v3128_v27  ;;  %1607 = vmatpush.bf16.msrb.mxu0 %v617_v46  ;;  %v494_v46 = vld [vmem:[%s2734_s5 + $0x7c8] sm:$0xff] }
 0x1b7   : > { %2249 = vmatmul.msk.bf16.vlgmr.msrb.gmra.mxu3 %vm658_vm0, %v3128_v27  ;;  %1643 = vmatpush.bf16.msrb.mxu2 %v619_v30  ;;  %v496_v30 = vld [vmem:[%s2734_s5 + $0x7d8] sm:$0xff] }
 0x1b8   : > { %1927 = vst [vmem:[%s2930_s26 + $0x70] sm:$0xff] %v1831_v23  ;;  %1661 = vmatpush.bf16.msrb.mxu3 %v620_v36  ;;  %1625 = vmatpush.bf16.msrb.mxu1 %v618_v52  ;;  %v431_v23 = vld [vmem:[%s2734_s5 + $0x5d0] sm:$0xff] }
 0x1b9   : > { %v1214_v29 = vpop.f32.mrf.mxu2 }
 0x1ba   : > { %v1215_v32 = vadd.f32 %v1214_v29, %v2913_v20  ;;  %v1232_v34 = vpop.f32.mrf.mxu3  ;;  %v1180_v35 = vpop.f32.mrf.mxu0  ;;  %1608 = vmatpush.bf16.msrb.mxu0 %v553_v12  ;;  %v623_v29 = vpack.c.bf16 %v495_v25, %v431_v23  ;;  %v366_v12 = vld [vmem:[%s2734_s5 + $0x3c8] sm:$0xff]  ;;  %v499_v23 = vld [vmem:[%s2734_s5 + $0x7f0] sm:$0xff]  ;;  %v436_v25 = vld [vmem:[%s2734_s5 + $0x5f8] sm:$0xff] }
 0x1bb   : > { %v1233_v37 = vadd.f32 %v1232_v34, %v2913_v20  ;;  %v1181_v38 = vadd.f32 %v1180_v35, %v2933_v33  ;;  %v1198_v39 = vpop.f32.mrf.mxu1  ;;  %1644 = vmatpush.bf16.msrb.mxu2 %v555_v63  ;;  %v624_v35 = vpack.c.bf16 %v496_v30, %v432_v26  ;;  %v368_v63 = vld [vmem:[%s2734_s5 + $0x3d8] sm:$0xff] }
 0x1bc   : > { %v1199_v40 = vadd.f32 %v1198_v39, %v2933_v33  ;;  %1662 = vmatpush.bf16.msrb.mxu3 %v556_v5  ;;  %1626 = vmatpush.bf16.msrb.mxu1 %v554_v15 }
 0x1bd   : > { %v1832_v24 = vpack.c.bf16 %v1233_v37, %v1215_v32 }
 0x1be   : > { %v1863_v41 = vpack.c.bf16 %v1199_v40, %v1181_v38 }
 0x1bf   : > { %1928 = vst [vmem:[%s2930_s26 + $0x78] sm:$0xff] %v1832_v24 }
 0x1c0   : > { %1959 = vst [vmem:[%s2930_s26 + $0x170] sm:$0xff] %v1863_v41  ;;  %v429_v41 = vld [vmem:[%s2734_s5 + $0x5c0] sm:$0xff] }
 0x1c1   : > { %v1216_v45 = vpop.f32.mrf.mxu2 }
 0x1c2   : > { %v1217_v48 = vadd.f32 %v1216_v45, %v2933_v33  ;;  %v1234_v49 = vpop.f32.mrf.mxu3  ;;  %v1183_v51 = vpop.f32.mrf.mxu0  ;;  %v621_v45 = vpack.c.bf16 %v493_v42, %v429_v41  ;;  %v497_v41 = vld [vmem:[%s2734_s5 + $0x7e0] sm:$0xff]  ;;  %v434_v42 = vld [vmem:[%s2734_s5 + $0x5e8] sm:$0xff] }
 0x1c3   : > { %v1235_v53 = vadd.f32 %v1234_v49, %v2933_v33  ;;  %v1184_v54 = vadd.f32 %v1183_v51, %v2945_v50  ;;  %v1201_v55 = vpop.f32.mrf.mxu1  ;;  %v622_v51 = vpack.c.bf16 %v494_v46, %v430_v43 }
 0x1c4   : > { %v1202_v56 = vadd.f32 %v1201_v55, %v2945_v50 }
 0x1c5   : > { %v1864_v57 = vpack.c.bf16 %v1235_v53, %v1217_v48  ;;  %2244 = vmatmul.msk.bf16.gmra.mxu0 %vm658_vm0, %v2803_v3  ;;  %2246 = vmatmul.msk.bf16.gmra.mxu1 %vm658_vm0, %v2803_v3 }
 0x1c6   : > { %v1895_v58 = vpack.c.bf16 %v1202_v56, %v1184_v54  ;;  %2248 = vmatmul.msk.bf16.gmra.mxu2 %vm658_vm0, %v2803_v3 }
 0x1c7   : > { %1960 = vst [vmem:[%s2930_s26 + $0x178] sm:$0xff] %v1864_v57  ;;  %2250 = vmatmul.msk.bf16.gmra.mxu3 %vm658_vm0, %v2803_v3 }
 0x1c8   : > { %1991 = vst [vmem:[%s2930_s26 + $0x270] sm:$0xff] %v1895_v58  ;;  %v303_v58 = vld [vmem:[%s2734_s5 + $0x1d0] sm:$0xff] }
 0x1c9   : > { %v1219_v62 = vpop.f32.mrf.mxu2 }
 0x1ca   : > { %v1220_v1 = vadd.f32 %v1219_v62, %v2945_v50  ;;  %v1237_v2 = vpop.f32.mrf.mxu3  ;;  %v1185_v4 = vpop.f32.mrf.mxu0  ;;  %v559_v62 = vpack.c.bf16 %v367_v59, %v303_v58  ;;  %v371_v58 = vld [vmem:[%s2734_s5 + $0x3f0] sm:$0xff]  ;;  %v308_v59 = vld [vmem:[%s2734_s5 + $0x1f8] sm:$0xff] }
 0x1cb   : > { %v1238_v6 = vadd.f32 %v1237_v2, %v2945_v50  ;;  %v1203_v7 = vpop.f32.mrf.mxu1  ;;  %v560_v4 = vpack.c.bf16 %v368_v63, %v304_v60 }
 0x1cd   : > { %v1896_v8 = vpack.c.bf16 %v1238_v6, %v1220_v1 }
 0x1cf   : > { %1992 = vst [vmem:[%s2930_s26 + $0x278] sm:$0xff] %v1896_v8  ;;  %v301_v8 = vld [vmem:[%s2734_s5 + $0x1c0] sm:$0xff] }
 0x1d0   : > { %v557_v11 = vpack.c.bf16 %v365_v9, %v301_v8  ;;  %v369_v8 = vld [vmem:[%s2734_s5 + $0x3e0] sm:$0xff]  ;;  %v306_v9 = vld [vmem:[%s2734_s5 + $0x1e8] sm:$0xff] }
 0x1d1   : > { %v1221_v14 = vpop.f32.mrf.mxu2 }
 0x1d2   : > { %v1239_v16 = vpop.f32.mrf.mxu3  ;;  %v1250_v17 = vpop.f32.mrf.mxu0  ;;  %v558_v14 = vpack.c.bf16 %v366_v12, %v302_v10 }
 0x1d3   : > { %v1251_v18 = vadd.f32 %v1250_v17, %v2913_v20  ;;  %v1268_v19 = vpop.f32.mrf.mxu1 }
 0x1d4   : > { %v1269_v21 = vadd.f32 %v1268_v19, %v2913_v20 }
 0x1d5   : > { %2251 = vmatmul.msk.bf16.vlgmr.msra.gmra.mxu0 %vm658_vm0, %v3128_v27  ;;  %2253 = vmatmul.msk.bf16.vlgmr.msra.gmra.mxu1 %vm658_vm0, %v3128_v27 }
 0x1d6   : > { %v1833_v22 = vpack.c.bf16 %v1269_v21, %v1251_v18  ;;  %2255 = vmatmul.msk.bf16.vlgmr.msra.gmra.mxu2 %vm658_vm0, %v3128_v27  ;;  %1679 = vmatpush.bf16.msra.mxu0 %v621_v45  ;;  %v498_v45 = vld [vmem:[%s2734_s5 + $0x7e8] sm:$0xff] }
 0x1d7   : > { %2257 = vmatmul.msk.bf16.vlgmr.msra.gmra.mxu3 %vm658_vm0, %v3128_v27  ;;  %1715 = vmatpush.bf16.msra.mxu2 %v623_v29  ;;  %v500_v29 = vld [vmem:[%s2734_s5 + $0x7f8] sm:$0xff] }
 0x1d8   : > { %1929 = vst [vmem:[%s2930_s26 + $0x80] sm:$0xff] %v1833_v22  ;;  %1733 = vmatpush.bf16.msra.mxu3 %v624_v35  ;;  %1697 = vmatpush.bf16.msra.mxu1 %v622_v51  ;;  %v435_v22 = vld [vmem:[%s2734_s5 + $0x5f0] sm:$0xff] }
 0x1d9   : > { %v1286_v28 = vpop.f32.mrf.mxu2 }
 0x1da   : > { %v1287_v31 = vadd.f32 %v1286_v28, %v2913_v20  ;;  %v1304_v32 = vpop.f32.mrf.mxu3  ;;  %v1252_v34 = vpop.f32.mrf.mxu0  ;;  %1680 = vmatpush.bf16.msra.mxu0 %v557_v11  ;;  %v627_v28 = vpack.c.bf16 %v499_v23, %v435_v22  ;;  %v370_v11 = vld [vmem:[%s2734_s5 + $0x3e8] sm:$0xff] }
 0x1db   : > { %v1305_v36 = vadd.f32 %v1304_v32, %v2913_v20  ;;  %v1253_v37 = vadd.f32 %v1252_v34, %v2933_v33  ;;  %v1270_v38 = vpop.f32.mrf.mxu1  ;;  %1716 = vmatpush.bf16.msra.mxu2 %v559_v62  ;;  %v628_v34 = vpack.c.bf16 %v500_v29, %v436_v25  ;;  %v372_v62 = vld [vmem:[%s2734_s5 + $0x3f8] sm:$0xff] }
 0x1dc   : > { %v1271_v39 = vadd.f32 %v1270_v38, %v2933_v33  ;;  %1734 = vmatpush.bf16.msra.mxu3 %v560_v4  ;;  %1698 = vmatpush.bf16.msra.mxu1 %v558_v14 }
 0x1dd   : > { %v1834_v40 = vpack.c.bf16 %v1305_v36, %v1287_v31 }
 0x1de   : > { %v1865_v24 = vpack.c.bf16 %v1271_v39, %v1253_v37 }
 0x1df   : > { %1930 = vst [vmem:[%s2930_s26 + $0x88] sm:$0xff] %v1834_v40 }
 0x1e0   : > { %1961 = vst [vmem:[%s2930_s26 + $0x180] sm:$0xff] %v1865_v24  ;;  %v433_v24 = vld [vmem:[%s2734_s5 + $0x5e0] sm:$0xff] }
 0x1e1   : > { %v1288_v44 = vpop.f32.mrf.mxu2 }
 0x1e2   : > { %v1289_v47 = vadd.f32 %v1288_v44, %v2933_v33  ;;  %v1306_v48 = vpop.f32.mrf.mxu3  ;;  %v1255_v49 = vpop.f32.mrf.mxu0  ;;  %v625_v44 = vpack.c.bf16 %v497_v41, %v433_v24 }
 0x1e3   : > { %v1307_v52 = vadd.f32 %v1306_v48, %v2933_v33  ;;  %v1256_v53 = vadd.f32 %v1255_v49, %v2945_v50  ;;  %v1273_v54 = vpop.f32.mrf.mxu1  ;;  %v626_v49 = vpack.c.bf16 %v498_v45, %v434_v42 }
 0x1e4   : > { %v1274_v55 = vadd.f32 %v1273_v54, %v2945_v50 }
 0x1e5   : > { %v1866_v56 = vpack.c.bf16 %v1307_v52, %v1289_v47  ;;  %2252 = vmatmul.msk.bf16.gmra.mxu0 %vm658_vm0, %v2803_v3  ;;  %2254 = vmatmul.msk.bf16.gmra.mxu1 %vm658_vm0, %v2803_v3 }
 0x1e6   : > { %v1897_v57 = vpack.c.bf16 %v1274_v55, %v1256_v53  ;;  %2256 = vmatmul.msk.bf16.gmra.mxu2 %vm658_vm0, %v2803_v3 }
 0x1e7   : > { %1962 = vst [vmem:[%s2930_s26 + $0x188] sm:$0xff] %v1866_v56  ;;  %2258 = vmatmul.msk.bf16.gmra.mxu3 %vm658_vm0, %v2803_v3 }
 0x1e8   : > { %1993 = vst [vmem:[%s2930_s26 + $0x280] sm:$0xff] %v1897_v57  ;;  %v307_v57 = vld [vmem:[%s2734_s5 + $0x1f0] sm:$0xff] }
 0x1e9   : > { %v1291_v61 = vpop.f32.mrf.mxu2 }
 0x1ea   : > { %v1292_v0 = vadd.f32 %v1291_v61, %v2945_v50  ;;  %v1309_v1 = vpop.f32.mrf.mxu3  ;;  %v1257_v2 = vpop.f32.mrf.mxu0  ;;  %v563_v61 = vpack.c.bf16 %v371_v58, %v307_v57 }
 0x1eb   : > { %v1310_v5 = vadd.f32 %v1309_v1, %v2945_v50  ;;  %v1275_v6 = vpop.f32.mrf.mxu1  ;;  %v564_v2 = vpack.c.bf16 %v372_v62, %v308_v59 }
 0x1ed   : > { %v1898_v7 = vpack.c.bf16 %v1310_v5, %v1292_v0 }
 0x1ef   : > { %1994 = vst [vmem:[%s2930_s26 + $0x288] sm:$0xff] %v1898_v7  ;;  %v305_v7 = vld [vmem:[%s2734_s5 + $0x1e0] sm:$0xff] }
 0x1f0   : > { %v561_v10 = vpack.c.bf16 %v369_v8, %v305_v7 }
 0x1f1   : > { %v1293_v13 = vpop.f32.mrf.mxu2 }
 0x1f2   : > { %v1311_v15 = vpop.f32.mrf.mxu3  ;;  %v1322_v16 = vpop.f32.mrf.mxu0  ;;  %v562_v13 = vpack.c.bf16 %v370_v11, %v306_v9 }
 0x1f3   : > { %v1323_v17 = vadd.f32 %v1322_v16, %v2913_v20  ;;  %v1340_v18 = vpop.f32.mrf.mxu1 }
 0x1f4   : > { %v1341_v19 = vadd.f32 %v1340_v18, %v2913_v20 }
 0x1f5   : > { %2259 = vmatmul.msk.bf16.vlgmr.msrb.gmra.mxu0 %vm658_vm0, %v3128_v27  ;;  %2261 = vmatmul.msk.bf16.vlgmr.msrb.gmra.mxu1 %vm658_vm0, %v3128_v27 }
 0x1f6   : > { %v1835_v21 = vpack.c.bf16 %v1341_v19, %v1323_v17  ;;  %2263 = vmatmul.msk.bf16.vlgmr.msrb.gmra.mxu2 %vm658_vm0, %v3128_v27  ;;  %1751 = vmatpush.bf16.msrb.mxu0 %v625_v44 }
 0x1f7   : > { %2265 = vmatmul.msk.bf16.vlgmr.msrb.gmra.mxu3 %vm658_vm0, %v3128_v27  ;;  %1787 = vmatpush.bf16.msrb.mxu2 %v627_v28 }
 0x1f8   : > { %1931 = vst [vmem:[%s2930_s26 + $0x90] sm:$0xff] %v1835_v21  ;;  %1805 = vmatpush.bf16.msrb.mxu3 %v628_v34  ;;  %1769 = vmatpush.bf16.msrb.mxu1 %v626_v49 }
 0x1f9   : > { %v1358_v26 = vpop.f32.mrf.mxu2 }
 0x1fa   : > { %v1359_v30 = vadd.f32 %v1358_v26, %v2913_v20  ;;  %v1376_v31 = vpop.f32.mrf.mxu3  ;;  %v1324_v32 = vpop.f32.mrf.mxu0  ;;  %1752 = vmatpush.bf16.msrb.mxu0 %v561_v10 }
 0x1fb   : > { %v1377_v35 = vadd.f32 %v1376_v31, %v2913_v20  ;;  %v1325_v36 = vadd.f32 %v1324_v32, %v2933_v33  ;;  %v1342_v37 = vpop.f32.mrf.mxu1  ;;  %1788 = vmatpush.bf16.msrb.mxu2 %v563_v61 }
 0x1fc   : > { %v1343_v38 = vadd.f32 %v1342_v37, %v2933_v33  ;;  %1806 = vmatpush.bf16.msrb.mxu3 %v564_v2  ;;  %1770 = vmatpush.bf16.msrb.mxu1 %v562_v13 }
 0x1fd   : > { %v1836_v39 = vpack.c.bf16 %v1377_v35, %v1359_v30 }
 0x1fe   : > { %v1867_v40 = vpack.c.bf16 %v1343_v38, %v1325_v36 }
 0x1ff   : > { %1932 = vst [vmem:[%s2930_s26 + $0x98] sm:$0xff] %v1836_v39 }
 0x200   : > { %1963 = vst [vmem:[%s2930_s26 + $0x190] sm:$0xff] %v1867_v40 }
 0x201   : > { %v1360_v43 = vpop.f32.mrf.mxu2 }
 0x202   : > { %v1361_v46 = vadd.f32 %v1360_v43, %v2933_v33  ;;  %v1378_v47 = vpop.f32.mrf.mxu3  ;;  %v1327_v48 = vpop.f32.mrf.mxu0 }
 0x203   : > { %v1379_v51 = vadd.f32 %v1378_v47, %v2933_v33  ;;  %v1328_v52 = vadd.f32 %v1327_v48, %v2945_v50  ;;  %v1345_v53 = vpop.f32.mrf.mxu1 }
 0x204   : > { %v1346_v54 = vadd.f32 %v1345_v53, %v2945_v50 }
 0x205   : > { %v1868_v55 = vpack.c.bf16 %v1379_v51, %v1361_v46  ;;  %2260 = vmatmul.msk.bf16.gmra.mxu0 %vm658_vm0, %v2803_v3  ;;  %2262 = vmatmul.msk.bf16.gmra.mxu1 %vm658_vm0, %v2803_v3 }
 0x206   : > { %v1899_v56 = vpack.c.bf16 %v1346_v54, %v1328_v52  ;;  %2264 = vmatmul.msk.bf16.gmra.mxu2 %vm658_vm0, %v2803_v3 }
 0x207   : > { %1964 = vst [vmem:[%s2930_s26 + $0x198] sm:$0xff] %v1868_v55  ;;  %2266 = vmatmul.msk.bf16.gmra.mxu3 %vm658_vm0, %v2803_v3 }
 0x208   : > { %1995 = vst [vmem:[%s2930_s26 + $0x290] sm:$0xff] %v1899_v56  ;;  %v2389_v56 = vld [vmem:[#allocation5] sm:$0xff] }
 0x209   : > { %v1363_v60 = vpop.f32.mrf.mxu2 }
 0x20a   : > { %v1364_v63 = vadd.f32 %v1363_v60, %v2945_v50  ;;  %v1381_v0 = vpop.f32.mrf.mxu3  ;;  %v1329_v1 = vpop.f32.mrf.mxu0 }
 0x20b   : > { %v1382_v4 = vadd.f32 %v1381_v0, %v2945_v50  ;;  %v1347_v5 = vpop.f32.mrf.mxu1 }
 0x20d   : > { %v1900_v6 = vpack.c.bf16 %v1382_v4, %v1364_v63 }
 0x20f   : > { %1996 = vst [vmem:[%s2930_s26 + $0x298] sm:$0xff] %v1900_v6 }
 0x211   : > { %v1365_v12 = vpop.f32.mrf.mxu2 }
 0x212   : > { %v1383_v14 = vpop.f32.mrf.mxu3  ;;  %v1394_v15 = vpop.f32.mrf.mxu0 }
 0x213   : > { %v1395_v16 = vadd.f32 %v1394_v15, %v2913_v20  ;;  %v1412_v17 = vpop.f32.mrf.mxu1 }
 0x214   : > { %v1413_v18 = vadd.f32 %v1412_v17, %v2913_v20 }
 0x215   : > { %2267 = vmatmul.msk.bf16.vlgmr.msra.gmra.mxu0 %vm658_vm0, %v3128_v27  ;;  %2269 = vmatmul.msk.bf16.vlgmr.msra.gmra.mxu1 %vm658_vm0, %v3128_v27 }
 0x216   : > { %v1837_v19 = vpack.c.bf16 %v1413_v18, %v1395_v16  ;;  %2271 = vmatmul.msk.bf16.vlgmr.msra.gmra.mxu2 %vm658_vm0, %v3128_v27 }
 0x217   : > { %2273 = vmatmul.msk.bf16.vlgmr.msra.gmra.mxu3 %vm658_vm0, %v3128_v27 }
 0x218   : > { %1933 = vst [vmem:[%s2930_s26 + $0xa0] sm:$0xff] %v1837_v19 }
 0x219   : > { %v1430_v21 = vpop.f32.mrf.mxu2 }
 0x21a   : > { %v1431_v22 = vadd.f32 %v1430_v21, %v2913_v20  ;;  %v1448_v23 = vpop.f32.mrf.mxu3  ;;  %v1396_v25 = vpop.f32.mrf.mxu0 }
 0x21b   : > { %v1449_v26 = vadd.f32 %v1448_v23, %v2913_v20  ;;  %v1397_v28 = vadd.f32 %v1396_v25, %v2933_v33  ;;  %v1414_v29 = vpop.f32.mrf.mxu1 }
 0x21c   : > { %v1415_v30 = vadd.f32 %v1414_v29, %v2933_v33 }
 0x21d   : > { %v1838_v31 = vpack.c.bf16 %v1449_v26, %v1431_v22 }
 0x21e   : > { %v1869_v32 = vpack.c.bf16 %v1415_v30, %v1397_v28 }
 0x21f   : > { %1934 = vst [vmem:[%s2930_s26 + $0xa8] sm:$0xff] %v1838_v31 }
 0x220   : > { %1965 = vst [vmem:[%s2930_s26 + $0x1a0] sm:$0xff] %v1869_v32 }
 0x221   : > { %v1432_v27 = vpop.f32.mrf.mxu2 }
 0x222   : > { %v1433_v34 = vadd.f32 %v1432_v27, %v2933_v33  ;;  %v1450_v35 = vpop.f32.mrf.mxu3  ;;  %v1399_v36 = vpop.f32.mrf.mxu0 }
 0x223   : > { %v1451_v37 = vadd.f32 %v1450_v35, %v2933_v33  ;;  %v1400_v38 = vadd.f32 %v1399_v36, %v2945_v50  ;;  %v1417_v39 = vpop.f32.mrf.mxu1 }
 0x224   : > { %v1418_v40 = vadd.f32 %v1417_v39, %v2945_v50 }
 0x225   : > { %v1870_v24 = vpack.c.bf16 %v1451_v37, %v1433_v34  ;;  %2268 = vmatmul.msk.bf16.gmra.mxu0 %vm658_vm0, %v2803_v3  ;;  %2270 = vmatmul.msk.bf16.gmra.mxu1 %vm658_vm0, %v2803_v3 }
 0x226   : > { %v1901_v41 = vpack.c.bf16 %v1418_v40, %v1400_v38  ;;  %2272 = vmatmul.msk.bf16.gmra.mxu2 %vm658_vm0, %v2803_v3 }
 0x227   : > { %1966 = vst [vmem:[%s2930_s26 + $0x1a8] sm:$0xff] %v1870_v24  ;;  %2274 = vmatmul.msk.bf16.gmra.mxu3 %vm658_vm0, %v2803_v3 }
 0x228   : > { %1997 = vst [vmem:[%s2930_s26 + $0x2a0] sm:$0xff] %v1901_v41 }
 0x229   : > { %v1435_v42 = vpop.f32.mrf.mxu2 }
 0x22a   : > { %v1436_v43 = vadd.f32 %v1435_v42, %v2945_v50  ;;  %v1453_v44 = vpop.f32.mrf.mxu3  ;;  %v1401_v45 = vpop.f32.mrf.mxu0 }
 0x22b   : > { %v1454_v46 = vadd.f32 %v1453_v44, %v2945_v50  ;;  %v1419_v47 = vpop.f32.mrf.mxu1 }
 0x22d   : > { %v1902_v48 = vpack.c.bf16 %v1454_v46, %v1436_v43 }
 0x22f   : > { %1998 = vst [vmem:[%s2930_s26 + $0x2a8] sm:$0xff] %v1902_v48 }
 0x231   : > { %v1437_v49 = vpop.f32.mrf.mxu2 }
 0x232   : > { %v1455_v51 = vpop.f32.mrf.mxu3  ;;  %v1466_v52 = vpop.f32.mrf.mxu0 }
 0x233   : > { %v1467_v53 = vadd.f32 %v1466_v52, %v2913_v20  ;;  %v1484_v54 = vpop.f32.mrf.mxu1 }
 0x234   : > { %v1485_v55 = vadd.f32 %v1484_v54, %v2913_v20 }
 0x235   : > { %2275 = vmatmul.msk.bf16.vlgmr.msrb.gmra.mxu0 %vm658_vm0, %v2389_v56  ;;  %2277 = vmatmul.msk.bf16.vlgmr.msrb.gmra.mxu1 %vm658_vm0, %v2389_v56 }
 0x236   : > { %v1839_v57 = vpack.c.bf16 %v1485_v55, %v1467_v53  ;;  %2279 = vmatmul.msk.bf16.vlgmr.msrb.gmra.mxu2 %vm658_vm0, %v2389_v56 }
 0x237   : > { %2281 = vmatmul.msk.bf16.vlgmr.msrb.gmra.mxu3 %vm658_vm0, %v2389_v56 }
 0x238   : > { %1935 = vst [vmem:[%s2930_s26 + $0xb0] sm:$0xff] %v1839_v57 }
 0x239   : > { %v1502_v58 = vpop.f32.mrf.mxu2 }
 0x23a   : > { %v1503_v59 = vadd.f32 %v1502_v58, %v2913_v20  ;;  %v1520_v60 = vpop.f32.mrf.mxu3  ;;  %v1468_v61 = vpop.f32.mrf.mxu0 }
 0x23b   : > { %v1521_v62 = vadd.f32 %v1520_v60, %v2913_v20  ;;  %v1469_v63 = vadd.f32 %v1468_v61, %v2933_v33  ;;  %v1486_v0 = vpop.f32.mrf.mxu1 }
 0x23c   : > { %v1487_v1 = vadd.f32 %v1486_v0, %v2933_v33 }
 0x23d   : > { %v1840_v2 = vpack.c.bf16 %v1521_v62, %v1503_v59 }
 0x23e   : > { %v1871_v4 = vpack.c.bf16 %v1487_v1, %v1469_v63 }
 0x23f   : > { %1936 = vst [vmem:[%s2930_s26 + $0xb8] sm:$0xff] %v1840_v2 }
 0x240   : > { %1967 = vst [vmem:[%s2930_s26 + $0x1b0] sm:$0xff] %v1871_v4 }
 0x241   : > { %v1504_v5 = vpop.f32.mrf.mxu2 }
 0x242   : > { %v1505_v6 = vadd.f32 %v1504_v5, %v2933_v33  ;;  %v1522_v7 = vpop.f32.mrf.mxu3  ;;  %v1471_v8 = vpop.f32.mrf.mxu0 }
 0x243   : > { %v1523_v9 = vadd.f32 %v1522_v7, %v2933_v33  ;;  %v1472_v10 = vadd.f32 %v1471_v8, %v2945_v50  ;;  %v1489_v11 = vpop.f32.mrf.mxu1 }
 0x244   : > { %v1490_v12 = vadd.f32 %v1489_v11, %v2945_v50 }
 0x245   : > { %v1872_v13 = vpack.c.bf16 %v1523_v9, %v1505_v6  ;;  %2276 = vmatmul.msk.bf16.gmra.mxu0 %vm658_vm0, %v2803_v3  ;;  %2278 = vmatmul.msk.bf16.gmra.mxu1 %vm658_vm0, %v2803_v3 }
 0x246   : > { %v1903_v14 = vpack.c.bf16 %v1490_v12, %v1472_v10  ;;  %2280 = vmatmul.msk.bf16.gmra.mxu2 %vm658_vm0, %v2803_v3 }
 0x247   : > { %1968 = vst [vmem:[%s2930_s26 + $0x1b8] sm:$0xff] %v1872_v13  ;;  %2282 = vmatmul.msk.bf16.gmra.mxu3 %vm658_vm0, %v2803_v3 }
 0x248   : > { %1999 = vst [vmem:[%s2930_s26 + $0x2b0] sm:$0xff] %v1903_v14 }
 0x249   : > { %v1507_v15 = vpop.f32.mrf.mxu2 }
 0x24a   : > { %v1508_v16 = vadd.f32 %v1507_v15, %v2945_v50  ;;  %v1525_v17 = vpop.f32.mrf.mxu3  ;;  %v1473_v18 = vpop.f32.mrf.mxu0 }
 0x24b   : > { %v1526_v19 = vadd.f32 %v1525_v17, %v2945_v50  ;;  %v1491_v21 = vpop.f32.mrf.mxu1 }
 0x24d   : > { %v1904_v22 = vpack.c.bf16 %v1526_v19, %v1508_v16 }
 0x24f   : > { %2000 = vst [vmem:[%s2930_s26 + $0x2b8] sm:$0xff] %v1904_v22 }
 0x251   : > { %v1509_v23 = vpop.f32.mrf.mxu2 }
 0x252   : > { %v1527_v25 = vpop.f32.mrf.mxu3  ;;  %v1538_v26 = vpop.f32.mrf.mxu0 }
 0x253   : > { %v1539_v28 = vadd.f32 %v1538_v26, %v2913_v20  ;;  %v1556_v3 = vpop.f32.mrf.mxu1 }
 0x254   : > { %v1557_v29 = vadd.f32 %v1556_v3, %v2913_v20 }
 0x256   : > { %v1841_v30 = vpack.c.bf16 %v1557_v29, %v1539_v28 }
 0x258   : > { %1937 = vst [vmem:[%s2930_s26 + $0xc0] sm:$0xff] %v1841_v30 }
 0x259   : > { %v1574_v31 = vpop.f32.mrf.mxu2 }
 0x25a   : > { %v1575_v32 = vadd.f32 %v1574_v31, %v2913_v20  ;;  %v1592_v27 = vpop.f32.mrf.mxu3  ;;  %v1540_v34 = vpop.f32.mrf.mxu0 }
 0x25b   : > { %v1593_v35 = vadd.f32 %v1592_v27, %v2913_v20  ;;  %v1541_v36 = vadd.f32 %v1540_v34, %v2933_v33  ;;  %v1558_v37 = vpop.f32.mrf.mxu1 }
 0x25c   : > { %v1559_v38 = vadd.f32 %v1558_v37, %v2933_v33 }
 0x25d   : > { %v1842_v39 = vpack.c.bf16 %v1593_v35, %v1575_v32 }
 0x25e   : > { %v1873_v40 = vpack.c.bf16 %v1559_v38, %v1541_v36 }
 0x25f   : > { %1938 = vst [vmem:[%s2930_s26 + $0xc8] sm:$0xff] %v1842_v39 }
 0x260   : > { %1969 = vst [vmem:[%s2930_s26 + $0x1c0] sm:$0xff] %v1873_v40 }
 0x261   : > { %v1576_v24 = vpop.f32.mrf.mxu2 }
 0x262   : > { %v1577_v41 = vadd.f32 %v1576_v24, %v2933_v33  ;;  %v1594_v42 = vpop.f32.mrf.mxu3  ;;  %v1543_v43 = vpop.f32.mrf.mxu0 }
 0x263   : > { %v1595_v44 = vadd.f32 %v1594_v42, %v2933_v33  ;;  %v1544_v45 = vadd.f32 %v1543_v43, %v2945_v50  ;;  %v1561_v46 = vpop.f32.mrf.mxu1 }
 0x264   : > { %v1562_v47 = vadd.f32 %v1561_v46, %v2945_v50 }
 0x265   : > { %v1874_v48 = vpack.c.bf16 %v1595_v44, %v1577_v41 }
 0x266   : > { %v1905_v49 = vpack.c.bf16 %v1562_v47, %v1544_v45 }
 0x267   : > { %1970 = vst [vmem:[%s2930_s26 + $0x1c8] sm:$0xff] %v1874_v48 }
 0x268   : > { %2001 = vst [vmem:[%s2930_s26 + $0x2c0] sm:$0xff] %v1905_v49 }
 0x269   : > { %v1579_v51 = vpop.f32.mrf.mxu2 }
 0x26a   : > { %v1580_v52 = vadd.f32 %v1579_v51, %v2945_v50  ;;  %v1597_v53 = vpop.f32.mrf.mxu3  ;;  %v1545_v54 = vpop.f32.mrf.mxu0 }
 0x26b   : > { %v1598_v55 = vadd.f32 %v1597_v53, %v2945_v50  ;;  %v1563_v56 = vpop.f32.mrf.mxu1 }
 0x26d   : > { %v1906_v57 = vpack.c.bf16 %v1598_v55, %v1580_v52 }
 0x26f   : > { %2002 = vst [vmem:[%s2930_s26 + $0x2c8] sm:$0xff] %v1906_v57 }
 0x271   : > { %v1581_v58 = vpop.f32.mrf.mxu2 }
 0x272   : > { %v1599_v59 = vpop.f32.mrf.mxu3  ;;  %v1610_v60 = vpop.f32.mrf.mxu0 }
 0x273   : > { %v1611_v61 = vadd.f32 %v1610_v60, %v2913_v20  ;;  %v1628_v62 = vpop.f32.mrf.mxu1 }
 0x274   : > { %v1629_v63 = vadd.f32 %v1628_v62, %v2913_v20 }
 0x276   : > { %v1843_v0 = vpack.c.bf16 %v1629_v63, %v1611_v61 }
 0x278   : > { %1939 = vst [vmem:[%s2930_s26 + $0xd0] sm:$0xff] %v1843_v0 }
 0x279   : > { %v1646_v1 = vpop.f32.mrf.mxu2 }
 0x27a   : > { %v1647_v2 = vadd.f32 %v1646_v1, %v2913_v20  ;;  %v1664_v4 = vpop.f32.mrf.mxu3  ;;  %v1612_v5 = vpop.f32.mrf.mxu0 }
 0x27b   : > { %v1665_v6 = vadd.f32 %v1664_v4, %v2913_v20  ;;  %v1613_v7 = vadd.f32 %v1612_v5, %v2933_v33  ;;  %v1630_v8 = vpop.f32.mrf.mxu1 }
 0x27c   : > { %v1631_v9 = vadd.f32 %v1630_v8, %v2933_v33 }
 0x27d   : > { %v1844_v10 = vpack.c.bf16 %v1665_v6, %v1647_v2 }
 0x27e   : > { %v1875_v11 = vpack.c.bf16 %v1631_v9, %v1613_v7 }
 0x27f   : > { %1940 = vst [vmem:[%s2930_s26 + $0xd8] sm:$0xff] %v1844_v10 }
 0x280   : > { %1971 = vst [vmem:[%s2930_s26 + $0x1d0] sm:$0xff] %v1875_v11 }
 0x281   : > { %v1648_v12 = vpop.f32.mrf.mxu2 }
 0x282   : > { %v1649_v13 = vadd.f32 %v1648_v12, %v2933_v33  ;;  %v1666_v14 = vpop.f32.mrf.mxu3  ;;  %v1615_v15 = vpop.f32.mrf.mxu0 }
 0x283   : > { %v1667_v16 = vadd.f32 %v1666_v14, %v2933_v33  ;;  %v1616_v17 = vadd.f32 %v1615_v15, %v2945_v50  ;;  %v1633_v18 = vpop.f32.mrf.mxu1 }
 0x284   : > { %v1634_v19 = vadd.f32 %v1633_v18, %v2945_v50 }
 0x285   : > { %v1876_v21 = vpack.c.bf16 %v1667_v16, %v1649_v13 }
 0x286   : > { %v1907_v22 = vpack.c.bf16 %v1634_v19, %v1616_v17 }
 0x287   : > { %1972 = vst [vmem:[%s2930_s26 + $0x1d8] sm:$0xff] %v1876_v21 }
 0x288   : > { %2003 = vst [vmem:[%s2930_s26 + $0x2d0] sm:$0xff] %v1907_v22 }
 0x289   : > { %v1651_v23 = vpop.f32.mrf.mxu2 }
 0x28a   : > { %v1652_v25 = vadd.f32 %v1651_v23, %v2945_v50  ;;  %v1669_v26 = vpop.f32.mrf.mxu3  ;;  %v1617_v28 = vpop.f32.mrf.mxu0 }
 0x28b   : > { %v1670_v3 = vadd.f32 %v1669_v26, %v2945_v50  ;;  %v1635_v29 = vpop.f32.mrf.mxu1 }
 0x28d   : > { %v1908_v30 = vpack.c.bf16 %v1670_v3, %v1652_v25 }
 0x28f   : > { %2004 = vst [vmem:[%s2930_s26 + $0x2d8] sm:$0xff] %v1908_v30 }
 0x291   : > { %v1653_v31 = vpop.f32.mrf.mxu2 }
 0x292   : > { %v1671_v32 = vpop.f32.mrf.mxu3  ;;  %v1682_v27 = vpop.f32.mrf.mxu0 }
 0x293   : > { %v1683_v34 = vadd.f32 %v1682_v27, %v2913_v20  ;;  %v1700_v35 = vpop.f32.mrf.mxu1 }
 0x294   : > { %v1701_v36 = vadd.f32 %v1700_v35, %v2913_v20 }
 0x296   : > { %v1845_v37 = vpack.c.bf16 %v1701_v36, %v1683_v34 }
 0x298   : > { %1941 = vst [vmem:[%s2930_s26 + $0xe0] sm:$0xff] %v1845_v37 }
 0x299   : > { %v1718_v38 = vpop.f32.mrf.mxu2 }
 0x29a   : > { %v1719_v39 = vadd.f32 %v1718_v38, %v2913_v20  ;;  %v1736_v40 = vpop.f32.mrf.mxu3  ;;  %v1684_v24 = vpop.f32.mrf.mxu0 }
 0x29b   : > { %v1737_v41 = vadd.f32 %v1736_v40, %v2913_v20  ;;  %v1685_v42 = vadd.f32 %v1684_v24, %v2933_v33  ;;  %v1702_v43 = vpop.f32.mrf.mxu1 }
 0x29c   : > { %v1703_v44 = vadd.f32 %v1702_v43, %v2933_v33 }
 0x29d   : > { %v1846_v45 = vpack.c.bf16 %v1737_v41, %v1719_v39 }
 0x29e   : > { %v1877_v46 = vpack.c.bf16 %v1703_v44, %v1685_v42 }
 0x29f   : > { %1942 = vst [vmem:[%s2930_s26 + $0xe8] sm:$0xff] %v1846_v45 }
 0x2a0   : > { %1973 = vst [vmem:[%s2930_s26 + $0x1e0] sm:$0xff] %v1877_v46 }
 0x2a1   : > { %v1720_v47 = vpop.f32.mrf.mxu2 }
 0x2a2   : > { %v1721_v48 = vadd.f32 %v1720_v47, %v2933_v33  ;;  %v1738_v49 = vpop.f32.mrf.mxu3  ;;  %v1687_v51 = vpop.f32.mrf.mxu0 }
 0x2a3   : > { %v1739_v52 = vadd.f32 %v1738_v49, %v2933_v33  ;;  %v1688_v53 = vadd.f32 %v1687_v51, %v2945_v50  ;;  %v1705_v54 = vpop.f32.mrf.mxu1 }
 0x2a4   : > { %v1706_v55 = vadd.f32 %v1705_v54, %v2945_v50 }
 0x2a5   : > { %v1878_v56 = vpack.c.bf16 %v1739_v52, %v1721_v48 }
 0x2a6   : > { %v1909_v57 = vpack.c.bf16 %v1706_v55, %v1688_v53 }
 0x2a7   : > { %1974 = vst [vmem:[%s2930_s26 + $0x1e8] sm:$0xff] %v1878_v56 }
 0x2a8   : > { %2005 = vst [vmem:[%s2930_s26 + $0x2e0] sm:$0xff] %v1909_v57 }
 0x2a9   : > { %v1723_v58 = vpop.f32.mrf.mxu2 }
 0x2aa   : > { %v1724_v59 = vadd.f32 %v1723_v58, %v2945_v50  ;;  %v1741_v60 = vpop.f32.mrf.mxu3  ;;  %v1689_v61 = vpop.f32.mrf.mxu0 }
 0x2ab   : > { %v1742_v62 = vadd.f32 %v1741_v60, %v2945_v50  ;;  %v1707_v63 = vpop.f32.mrf.mxu1 }
 0x2ad   : > { %v1910_v0 = vpack.c.bf16 %v1742_v62, %v1724_v59 }
 0x2af   : > { %2006 = vst [vmem:[%s2930_s26 + $0x2e8] sm:$0xff] %v1910_v0 }
 0x2b1   : > { %v1725_v1 = vpop.f32.mrf.mxu2 }
 0x2b2   : > { %v1743_v2 = vpop.f32.mrf.mxu3  ;;  %v1754_v4 = vpop.f32.mrf.mxu0 }
 0x2b3   : > { %v1755_v5 = vadd.f32 %v1754_v4, %v2913_v20  ;;  %v1772_v6 = vpop.f32.mrf.mxu1 }
 0x2b4   : > { %v1773_v7 = vadd.f32 %v1772_v6, %v2913_v20 }
 0x2b6   : > { %v1847_v8 = vpack.c.bf16 %v1773_v7, %v1755_v5 }
 0x2b8   : > { %1943 = vst [vmem:[%s2930_s26 + $0xf0] sm:$0xff] %v1847_v8 }
 0x2b9   : > { %v1790_v9 = vpop.f32.mrf.mxu2 }
 0x2ba   : > { %v1791_v10 = vadd.f32 %v1790_v9, %v2913_v20  ;;  %v1808_v11 = vpop.f32.mrf.mxu3  ;;  %v1756_v12 = vpop.f32.mrf.mxu0 }
 0x2bb   : > { %v1809_v13 = vadd.f32 %v1808_v11, %v2913_v20  ;;  %v1757_v14 = vadd.f32 %v1756_v12, %v2933_v33  ;;  %v1774_v15 = vpop.f32.mrf.mxu1 }
 0x2bc   : > { %v1775_v16 = vadd.f32 %v1774_v15, %v2933_v33 }
 0x2bd   : > { %v1848_v17 = vpack.c.bf16 %v1809_v13, %v1791_v10 }
 0x2be   : > { %v1879_v18 = vpack.c.bf16 %v1775_v16, %v1757_v14 }
 0x2bf   : > { %1944 = vst [vmem:[%s2930_s26 + $0xf8] sm:$0xff] %v1848_v17 }
 0x2c0   : > { %1975 = vst [vmem:[%s2930_s26 + $0x1f0] sm:$0xff] %v1879_v18 }
 0x2c1   : > { %v1792_v19 = vpop.f32.mrf.mxu2 }
 0x2c2   : > { %v1793_v21 = vadd.f32 %v1792_v19, %v2933_v33  ;;  %v1810_v22 = vpop.f32.mrf.mxu3  ;;  %v1759_v23 = vpop.f32.mrf.mxu0 }
 0x2c3   : > { %v1811_v25 = vadd.f32 %v1810_v22, %v2933_v33  ;;  %v1760_v20 = vadd.f32 %v1759_v23, %v2945_v50  ;;  %v1777_v26 = vpop.f32.mrf.mxu1 }
 0x2c4   : > { %v1778_v28 = vadd.f32 %v1777_v26, %v2945_v50 }
 0x2c5   : > { %v1880_v3 = vpack.c.bf16 %v1811_v25, %v1793_v21 }
 0x2c6   : > { %v1911_v29 = vpack.c.bf16 %v1778_v28, %v1760_v20 }
 0x2c7   : > { %1976 = vst [vmem:[%s2930_s26 + $0x1f8] sm:$0xff] %v1880_v3 }
 0x2c8   : > { %2007 = vst [vmem:[%s2930_s26 + $0x2f0] sm:$0xff] %v1911_v29 }
 0x2c9   : > { %v1795_v30 = vpop.f32.mrf.mxu2 }
 0x2ca   : > { %v1796_v31 = vadd.f32 %v1795_v30, %v2945_v50  ;;  %v1813_v32 = vpop.f32.mrf.mxu3  ;;  %v1761_v27 = vpop.f32.mrf.mxu0 }
 0x2cb   : > { %v1814_v34 = vadd.f32 %v1813_v32, %v2945_v50  ;;  %v1779_v35 = vpop.f32.mrf.mxu1 }
 0x2cd   : > { %v1912_v36 = vpack.c.bf16 %v1814_v34, %v1796_v31 }
 0x2ce   : > { %2016 = sbr.rel (!%p2675_p9) target bundleno = 760 (0x2f8), region = 44 }
 0x2cf   : > { %2008 = vst [vmem:[%s2930_s26 + $0x2f8] sm:$0xff] %v1912_v36 }
 0x2d1   : > { %v1797_v33 = vpop.f32.mrf.mxu2 }
 0x2d2   : > { %v1815_v37 = vpop.f32.mrf.mxu3 }
 0x2d3   : > { %s3686_s11 = smov (!%p2019_p6, %s2018_s11), 64 }
 0x2d4   : > { %s2021_s25 = smul.u32 12, %s3686_s11 }
 0x2d6   : > { %s2022_s4 = ssub.s32 768, %s2021_s25 }
 0x2d7   : > { %s2023_s1 = sshll.u32 %s2022_s4, 4 }
 0x2d8   : > { %2024 = vsyncadd %s2010_s21, %s2023_s1  ;;  %p3573_p8 = scmp.ne.s32.totalorder %s2021_s25, 0  ;;  %s2296_s9 = smul.u32 324, %s2560_s16 }
 0x2d9   : > { %s2286_s15 = sshll.u32 %s3686_s11, 2  ;;  %s2032_s20 = sshll.u32 %s2930_s26, 4  ;;  %s3580_s20 = int_to_ptr.vmem [resolvable:$true] %s2032_s20 }
 0x2da   : > { %s2027_s22 = sadd.s32 %s2296_s9, %s2283_s24  ;;  %s3583_s17 = smul.u32 192, %s3686_s11 }
 0x2db   : > { %s2285_s6 = sshll.u32 %s2027_s22, 2  ;;  %s2459_s16 = sshra.s32 %s3580_s20, 4  ;;  %s2460_s16 = int_to_ptr.vmem [resolvable:$true] %s2459_s16 }
 0x2dc   : > { %s2029_s23 = scalar_lea.hbm %s3644_s3, %s2285_s6  ;;  %s2461_s28 = sshrl.u32 %s3583_s17, 4 }
 0x2dd   : > { %s2034_s27 = sshll.u32 %s2029_s23, 4  ;;  %s2497_s7 = sshll.u32 %s2461_s28, 4  ;;  %s3588_s27 = int_to_ptr.hbm [resolvable:$true] %s2034_s27 }
 0x2de   : > { %p2463_p9 = scmp.ne.s32.totalorder %s2497_s7, %s3583_s17  ;;  %s2464_s30 = sadd.s32 1, %s2461_s28 }
 0x2df   : > { %s2581_s10 = smov [#allocation7]  }
 0x2e0   : > { %s3688_s30 = smov (!%p2463_p9, %s2464_s30), %s2461_s28  ;;  %s2470_s26 = scalar_lea.vmem %s2581_s10, 1536 }
 0x2e1   : > { %s2466_s8 = scalar_lea.vmem %s2460_s16, %s3688_s30 }
 0x2e2   : > { %p2467_p2 = scmp.ne.s32.totalorder %s2460_s16, %s2466_s8  ;;  %p2472_p7 = scmp.lt.s32.totalorder %s2470_s26, %s2466_s8 }
 0x2e4   : > { %p2468_p4 = pnand %p2467_p2, %p3573_p8 }
 0x2e6   : > { %p2469_p5 = pneg %p2468_p4 }
 0x2e8   : > { %p2474_p3 = pnand %p2472_p7, %p2469_p5 }
 0x2ea   : > { %2477 = shalt.err (!%p2474_p3)
}
 0x2eb   : > { %s2478_s24 = sshra.s32 %s3588_s27, 4  ;;  %s2489_s9 = scalar_lea.hbm %s3644_s3, 2592  ;;  %s2479_s24 = int_to_ptr.hbm [resolvable:$true] %s2478_s24 }
 0x2ec   : > { %s2485_s25 = scalar_lea.hbm %s2479_s24, %s3688_s30  ;;  %p2490_p0 = scmp.lt.s32.totalorder %s2479_s24, %s3644_s3 }
 0x2ed   : > { %p2486_p10 = scmp.ne.s32.totalorder %s2479_s24, %s2485_s25  ;;  %p2491_p1 = scmp.lt.s32.totalorder %s2489_s9, %s2485_s25 }
 0x2ef   : > { %p2487_p11 = pnand %p2486_p10, %p3573_p8  ;;  %p2492_p6 = por %p2491_p1, %p2490_p0 }
 0x2f1   : > { %p2488_p12 = pneg %p2487_p11 }
 0x2f3   : > { %p2493_p9 = pnand %p2492_p6, %p2488_p12 }
 0x2f5   : > { %2496 = shalt.err (!%p2493_p9)
}
 0x2f6   : > { %s2582_s18 = smov 4096   ;;  %s2583_s5 = smov 6912  }
 0x2f7   : > { %2040 = dma.vmem_to_hbm [thread:$0]  (%p3573_p8), %s3580_s20, %s3583_s17, %s3588_s27, %s2010_s21, %s2582_s18, %s2583_s5, %s2286_s15  }
 0x2f8 PF: > { %p2313_p2 = scmp.ge.s32.totalorder %s2572_s19, 2  ;;  %s2049_s16 = sand.u32 1, %s2544_s12  }
 0x2f9   : > { %s2050_s28 = scalar_lea.sflag [#allocation4], %s2049_s16 }
 0x2fa   : > { %p2308_p4 = pnand %p2313_p2, %p2682_p13 }
 0x2fc   : > { %p2309_p5 = pneg %p2308_p4 }
 0x2fe   : > { %2539 = dma.done.wait (%p2309_p5), %s2050_s28, 12288  }
 0x2ff   : > { %2541 = vsyncadd (%p2309_p5), %s2050_s28, 4294955008  ;;  %s20_s19 = sadd.s32 1, %s2572_s19   ;;  %s3669_s11 = sld [smem:[#allocation11_spill]] }
 0x300   : > { %p17_p7 = scmp.ge.s32.totalorder %s20_s19, 6   ;;  %s3670_s14 = sld [smem:[#allocation17_spill]] }
 0x301   : > { %s3671_s15 = sld [smem:[#allocation12_spill]]  ;;  %s3675_s12 = smov %s2548_s13 }
 0x302   : > { %s3672_s16 = sld [smem:[#allocation13_spill]]  ;;  %19 = sbr.rel (!%p17_p7) target bundleno = 10 (0xa), region = 81 }
 0x303   : > { %s3673_s17 = sld [smem:[#allocation14_spill]] }
 0x304   : > { %s3674_s18 = sld [smem:[#allocation15_spill]] }
 0x305   : > { %s3676_s13 = smov %s3669_s11 }
 0x307   :  { %2056 = vsyncpa [#allocation3], 1 }
 0x308   :  { %2058 = vsyncpa [#allocation3 + $0x1], 1 }
 0x309   :  { %2059 = vsyncpa [#allocation6], 1 }
 0x30a   :  { %2060 = vsyncpa [#allocation4], 1 }
 0x30b   :  { %2062 = vsyncpa [#allocation4 + $0x1], 1 }

</bundles_post_ra>
